<compile_context>
chip_gen: v7x
topology: tpu7x:2x2x1
jax: 0.10.0
libtpu: 0.0.40
codegen_flags: <defaults>
</compile_context>

<pallas_src>
import jax
import jax.numpy as jnp
import numpy as np
from jax.experimental import pallas as pl
from jax.experimental.pallas import tpu as pltpu


# ------------------------------ Pallas kernel ------------------------------ #
def _shift_rows(v, s):
    """u[r] = v[r + s] with zero fill at the boundary (s in {-1, +1})."""
    if s == 0:
        return v
    zero = jnp.zeros((1, v.shape[1]), v.dtype)
    if s > 0:
        return jnp.concatenate([v[s:, :], zero], axis=0)
    return jnp.concatenate([zero, v[:s, :]], axis=0)


def _conv3_taps(v, w_ref, b_ref):
    """One 3x3 conv layer: sum_i rowshift(v, i-1) @ w_ref[i]  + bias.

    v is (R, Wp*Cin); w_ref[i] is the (Wp*Cin, Wp*Cout) banded matrix that
    carries the three width taps + channel mixing for height tap i.
    """
    acc = jnp.dot(v, w_ref[1], preferred_element_type=jnp.float32)
    acc = acc + jnp.dot(_shift_rows(v, -1), w_ref[0],
                        preferred_element_type=jnp.float32)
    acc = acc + jnp.dot(_shift_rows(v, +1), w_ref[2],
                        preferred_element_type=jnp.float32)
    return acc + b_ref[...]


def _bnet_fused_kernel(x_ref, w1_ref, b1_ref, rmask_ref, cmask_ref,
                       w2_ref, b2_ref, o_ref):
    x = x_ref[...]                                      # (R, Wp*Cin), padded
    mid = jnp.maximum(_conv3_taps(x, w1_ref, b1_ref), 0.0)
    # Zero halo rows/cols so conv2 sees correct SAME padding, and discard any
    # garbage computed at halo / row-pad positions (from the row shifts).
    mid = mid * (rmask_ref[...] * cmask_ref[...])       # (R,1)*(1,C) broadcast
    o_ref[...] = _conv3_taps(mid, w2_ref, b2_ref).astype(o_ref.dtype)


# ----------------------- one-time weight repacking ------------------------- #
def _banded_width_weights(w_hwio, wp):
    """Fold width taps + channel mixing of a 3x3 HWIO kernel into a band matrix
    per height tap.  Returns (3, wp*cin, wp*cout) with
        B[i][q'*cin + ci, q*cout + co] = w[i, q'-q+1, ci, co]  if |q'-q| <= 1.
    """
    kh, kw, cin, cout = w_hwio.shape
    bands = []
    for i in range(kh):
        b = jnp.zeros((wp * cin, wp * cout), jnp.float32)
        for j in range(kw):
            # width tap j connects input width-block q+j-1 to output block q
            d = jnp.eye(wp, k=1 - j, dtype=jnp.float32)
            b = b + jnp.kron(d, w_hwio[i, j].astype(jnp.float32))
        bands.append(b)
    return jnp.stack(bands)


def pack_bnet_params(params, input_shape):
    """Inference-time repacking: banded weights, tiled biases, halo masks."""
    n, c, h, w = input_shape
    hp, wp = h + 2, w + 2
    c_mid = params["w1"].shape[-1]

    w1b = _banded_width_weights(params["w1"], wp)       # (3, wp*c,     wp*c_mid)
    w2b = _banded_width_weights(params["w2"], wp)       # (3, wp*c_mid, wp*oc)
    b1r = jnp.tile(params["b1"], wp)[None, :]           # (1, wp*c_mid)
    b2r = jnp.tile(params["b2"], wp)[None, :]           # (1, wp*oc)

    r = n * hp
    r_pad = ((r + 7) // 8) * 8                          # clean sublane tiling
    rows = np.arange(r_pad)
    row_ok = (rows < r) & ((rows % hp) >= 1) & ((rows % hp) <= h)
    cols = np.arange(wp * c_mid) // c_mid
    col_ok = (cols >= 1) & (cols <= w)

    rmask = jnp.asarray(row_ok.astype(np.float32))[:, None]   # (r_pad, 1)
    cmask = jnp.asarray(col_ok.astype(np.float32))[None, :]   # (1, wp*c_mid)

    return {"w1b": w1b, "b1r": b1r, "rmask": rmask, "cmask": cmask,
            "w2b": w2b, "b2r": b2r}


# ------------------------------ BNet forward ------------------------------- #
def bnet_forward(x_nchw, packed):
    """BNet.forward(x) == self.model(x) for the fused BConv2d stack."""
    n, c, h, w = x_nchw.shape
    hp, wp = h + 2, w + 2
    c_mid = packed["b1r"].shape[1] // wp
    oc = packed["b2r"].shape[1] // wp
    r = n * hp
    r_pad = packed["rmask"].shape[0]

    x = jnp.transpose(x_nchw, (0, 2, 3, 1))              # NCHW -> NHWC
    xpad = jnp.pad(x, ((0, 0), (1, 1), (1, 1), (0, 0)))  # SAME halo
    x2 = xpad.reshape(r, wp * c)                         # rows=(n,h) cols=(w,c)
    x2 = jnp.pad(x2, ((0, r_pad - r), (0, 0)))           # sublane-align rows

    out2 = pl.pallas_call(
        _bnet_fused_kernel,
        out_shape=jax.ShapeDtypeStruct((r_pad, wp * oc), jnp.float32),
        grid=(1,),                              # single step: whole problem fits VMEM
        in_specs=[
            pl.BlockSpec((r_pad, wp * c), lambda i: (0, 0)),
            pl.BlockSpec(packed["w1b"].shape, lambda i: (0, 0, 0)),
            pl.BlockSpec((1, wp * c_mid), lambda i: (0, 0)),
            pl.BlockSpec((r_pad, 1), lambda i: (0, 0)),
            pl.BlockSpec((1, wp * c_mid), lambda i: (0, 0)),
            pl.BlockSpec(packed["w2b"].shape, lambda i: (0, 0, 0)),
            pl.BlockSpec((1, wp * oc), lambda i: (0, 0)),
        ],
        out_specs=pl.BlockSpec((r_pad, wp * oc), lambda i: (0, 0)),
        compiler_params=pltpu.CompilerParams(
            dimension_semantics=("arbitrary",)),
    )(x2, packed["w1b"], packed["b1r"], packed["rmask"], packed["cmask"],
      packed["w2b"], packed["b2r"])

    out = out2[:r].reshape(n, hp, wp, oc)[:, 1:h + 1, 1:w + 1, :]   # drop halo
    return jnp.transpose(out, (0, 3, 1, 2))                         # NHWC -> NCHW


def init_params(key, c_in=4, c_mid=32, c_out=8, k=3):
    k1, k2, k3, k4 = jax.random.split(key, 4)
    # Weights stored in HWIO (KH, KW, C_in, C_out).
    return {
        "w1": 0.1 * jax.random.normal(k1, (k, k, c_in, c_mid), jnp.float32),
        "b1": 0.1 * jax.random.normal(k2, (c_mid,), jnp.float32),
        "w2": 0.1 * jax.random.normal(k3, (k, k, c_mid, c_out), jnp.float32),
        "b2": 0.1 * jax.random.normal(k4, (c_out,), jnp.float32),
    }


# ---------------------------- reference (lax) ------------------------------ #
def _ref_forward(x_nchw, params):
    def conv(x, w_hwio, b):
        w_oihw = jnp.transpose(w_hwio, (3, 2, 0, 1))
        y = jax.lax.conv_general_dilated(
            x, w_oihw, window_strides=(1, 1), padding="SAME",
            dimension_numbers=("NCHW", "OIHW", "NCHW"))
        return y + b[None, :, None, None]
    x = jnp.maximum(conv(x_nchw, params["w1"], params["b1"]), 0.0)
    return conv(x, params["w2"], params["b2"])


if __name__ == "__main__":
    key = jax.random.PRNGKey(0)
    kx, kp = jax.random.split(key)

    # cfg.dataset.input_shape -> small synthetic (N, C, H, W)
    x = jax.random.normal(kx, (2, 4, 16, 16), jnp.float32)
    params = init_params(kp)
    packed = pack_bnet_params(params, x.shape)           # one-time repacking

    fwd = jax.jit(bnet_forward)
    out = jax.block_until_ready(fwd(x, packed))

    ref = jax.block_until_ready(_ref_forward(x, params))
    assert out.shape == (2, 8, 16, 16), out.shape
    np.testing.assert_allclose(np.asarray(out), np.asarray(ref),
                               rtol=1e-4, atol=1e-4)
    print("KERNEL_OK")
</pallas_src>

<mosaic_0001>
module attributes {stable_mosaic.version = 11 : i64} {
  func.func @_bnet_fused_kernel(%arg0: i32, %arg1: memref<40x72xf32, #tpu.memory_space<vmem>>, %arg2: memref<3x72x576xf32, #tpu.memory_space<vmem>>, %arg3: memref<1x576xf32, #tpu.memory_space<vmem>>, %arg4: memref<40x1xf32, #tpu.memory_space<vmem>>, %arg5: memref<1x576xf32, #tpu.memory_space<vmem>>, %arg6: memref<3x576x144xf32, #tpu.memory_space<vmem>>, %arg7: memref<1x144xf32, #tpu.memory_space<vmem>>, %arg8: memref<40x144xf32, #tpu.memory_space<vmem>>) attributes {dimension_semantics = [#tpu.dimension_semantics<arbitrary>], iteration_bounds = array<i64: 1>, scalar_prefetch = 0 : i64, scratch_operands = 0 : i64, tpu.core_type = #tpu.core_type<tc>, window_params = [{pipeline_mode = #tpu.pipeline_mode<synchronous>, transform_indices = @transform_0, window_bounds = array<i64: 40, 72>}, {pipeline_mode = #tpu.pipeline_mode<synchronous>, transform_indices = @transform_1, window_bounds = array<i64: 3, 72, 576>}, {pipeline_mode = #tpu.pipeline_mode<synchronous>, transform_indices = @transform_2, window_bounds = array<i64: 1, 576>}, {pipeline_mode = #tpu.pipeline_mode<synchronous>, transform_indices = @transform_3, window_bounds = array<i64: 40, 1>}, {pipeline_mode = #tpu.pipeline_mode<synchronous>, transform_indices = @transform_4, window_bounds = array<i64: 1, 576>}, {pipeline_mode = #tpu.pipeline_mode<synchronous>, transform_indices = @transform_5, window_bounds = array<i64: 3, 576, 144>}, {pipeline_mode = #tpu.pipeline_mode<synchronous>, transform_indices = @transform_6, window_bounds = array<i64: 1, 144>}, {pipeline_mode = #tpu.pipeline_mode<synchronous>, transform_indices = @transform_7, window_bounds = array<i64: 40, 144>}]} {
    %c0 = arith.constant 0 : index
    %c0_0 = arith.constant 0 : index
    %0 = vector.load %arg1[%c0, %c0_0] : memref<40x72xf32, #tpu.memory_space<vmem>>, vector<40x72xf32>
    %c1 = arith.constant 1 : index
    %c0_1 = arith.constant 0 : index
    %c0_2 = arith.constant 0 : index
    %1 = vector.load %arg2[%c1, %c0_1, %c0_2] : memref<3x72x576xf32, #tpu.memory_space<vmem>>, vector<1x72x576xf32>
    %2 = vector.shape_cast %1 : vector<1x72x576xf32> to vector<72x576xf32>
    %cst = arith.constant dense<0.000000e+00> : vector<40x576xf32>
    %3 = tpu.matmul %0, %2, %cst {dimension_numbers = #tpu.dot_dimension_numbers<[1], [0], [0], [1], [0, 0, 1, 1], [], []>} : vector<40x72xf32>, vector<72x576xf32>, vector<40x576xf32> -> vector<40x576xf32>
    %cst_3 = arith.constant 0.000000e+00 : f32
    %4 = vector.broadcast %cst_3 : f32 to vector<1x72xf32>
    %5 = vector.extract_strided_slice %0 {offsets = [0, 0], sizes = [39, 72], strides = [1, 1]} : vector<40x72xf32> to vector<39x72xf32>
    %6 = tpu.concatenate %4, %5 in 0 : vector<1x72xf32>, vector<39x72xf32> -> vector<40x72xf32>
    %c0_4 = arith.constant 0 : index
    %c0_5 = arith.constant 0 : index
    %c0_6 = arith.constant 0 : index
    %7 = vector.load %arg2[%c0_4, %c0_5, %c0_6] : memref<3x72x576xf32, #tpu.memory_space<vmem>>, vector<1x72x576xf32>
    %8 = vector.shape_cast %7 : vector<1x72x576xf32> to vector<72x576xf32>
    %cst_7 = arith.constant dense<0.000000e+00> : vector<40x576xf32>
    %9 = tpu.matmul %6, %8, %cst_7 {dimension_numbers = #tpu.dot_dimension_numbers<[1], [0], [0], [1], [0, 0, 1, 1], [], []>} : vector<40x72xf32>, vector<72x576xf32>, vector<40x576xf32> -> vector<40x576xf32>
    %10 = arith.addf %3, %9 : vector<40x576xf32>
    %cst_8 = arith.constant 0.000000e+00 : f32
    %11 = vector.broadcast %cst_8 : f32 to vector<1x72xf32>
    %12 = vector.extract_strided_slice %0 {offsets = [1, 0], sizes = [39, 72], strides = [1, 1]} : vector<40x72xf32> to vector<39x72xf32>
    %13 = tpu.concatenate %12, %11 in 0 : vector<39x72xf32>, vector<1x72xf32> -> vector<40x72xf32>
    %c2 = arith.constant 2 : index
    %c0_9 = arith.constant 0 : index
    %c0_10 = arith.constant 0 : index
    %14 = vector.load %arg2[%c2, %c0_9, %c0_10] : memref<3x72x576xf32, #tpu.memory_space<vmem>>, vector<1x72x576xf32>
    %15 = vector.shape_cast %14 : vector<1x72x576xf32> to vector<72x576xf32>
    %cst_11 = arith.constant dense<0.000000e+00> : vector<40x576xf32>
    %16 = tpu.matmul %13, %15, %cst_11 {dimension_numbers = #tpu.dot_dimension_numbers<[1], [0], [0], [1], [0, 0, 1, 1], [], []>} : vector<40x72xf32>, vector<72x576xf32>, vector<40x576xf32> -> vector<40x576xf32>
    %17 = arith.addf %10, %16 : vector<40x576xf32>
    %c0_12 = arith.constant 0 : index
    %c0_13 = arith.constant 0 : index
    %18 = vector.load %arg3[%c0_12, %c0_13] : memref<1x576xf32, #tpu.memory_space<vmem>>, vector<1x576xf32>
    %19 = vector.broadcast %18 : vector<1x576xf32> to vector<40x576xf32>
    %20 = arith.addf %17, %19 : vector<40x576xf32>
    %cst_14 = arith.constant 0.000000e+00 : f32
    %21 = vector.broadcast %cst_14 : f32 to vector<40x576xf32>
    %22 = arith.maximumf %20, %21 : vector<40x576xf32>
    %c0_15 = arith.constant 0 : index
    %c0_16 = arith.constant 0 : index
    %23 = vector.load %arg4[%c0_15, %c0_16] : memref<40x1xf32, #tpu.memory_space<vmem>>, vector<40x1xf32>
    %c0_17 = arith.constant 0 : index
    %c0_18 = arith.constant 0 : index
    %24 = vector.load %arg5[%c0_17, %c0_18] : memref<1x576xf32, #tpu.memory_space<vmem>>, vector<1x576xf32>
    %25 = vector.broadcast %23 : vector<40x1xf32> to vector<40x576xf32>
    %26 = vector.broadcast %24 : vector<1x576xf32> to vector<40x576xf32>
    %27 = arith.mulf %25, %26 : vector<40x576xf32>
    %28 = arith.mulf %22, %27 : vector<40x576xf32>
    %c1_19 = arith.constant 1 : index
    %c0_20 = arith.constant 0 : index
    %c0_21 = arith.constant 0 : index
    %29 = vector.load %arg6[%c1_19, %c0_20, %c0_21] : memref<3x576x144xf32, #tpu.memory_space<vmem>>, vector<1x576x144xf32>
    %30 = vector.shape_cast %29 : vector<1x576x144xf32> to vector<576x144xf32>
    %cst_22 = arith.constant dense<0.000000e+00> : vector<40x144xf32>
    %31 = tpu.matmul %28, %30, %cst_22 {dimension_numbers = #tpu.dot_dimension_numbers<[1], [0], [0], [1], [0, 0, 1, 1], [], []>} : vector<40x576xf32>, vector<576x144xf32>, vector<40x144xf32> -> vector<40x144xf32>
    %cst_23 = arith.constant 0.000000e+00 : f32
    %32 = vector.broadcast %cst_23 : f32 to vector<1x576xf32>
    %33 = vector.extract_strided_slice %28 {offsets = [0, 0], sizes = [39, 576], strides = [1, 1]} : vector<40x576xf32> to vector<39x576xf32>
    %34 = tpu.concatenate %32, %33 in 0 : vector<1x576xf32>, vector<39x576xf32> -> vector<40x576xf32>
    %c0_24 = arith.constant 0 : index
    %c0_25 = arith.constant 0 : index
    %c0_26 = arith.constant 0 : index
    %35 = vector.load %arg6[%c0_24, %c0_25, %c0_26] : memref<3x576x144xf32, #tpu.memory_space<vmem>>, vector<1x576x144xf32>
    %36 = vector.shape_cast %35 : vector<1x576x144xf32> to vector<576x144xf32>
    %cst_27 = arith.constant dense<0.000000e+00> : vector<40x144xf32>
    %37 = tpu.matmul %34, %36, %cst_27 {dimension_numbers = #tpu.dot_dimension_numbers<[1], [0], [0], [1], [0, 0, 1, 1], [], []>} : vector<40x576xf32>, vector<576x144xf32>, vector<40x144xf32> -> vector<40x144xf32>
    %38 = arith.addf %31, %37 : vector<40x144xf32>
    %cst_28 = arith.constant 0.000000e+00 : f32
    %39 = vector.broadcast %cst_28 : f32 to vector<1x576xf32>
    %40 = vector.extract_strided_slice %28 {offsets = [1, 0], sizes = [39, 576], strides = [1, 1]} : vector<40x576xf32> to vector<39x576xf32>
    %41 = tpu.concatenate %40, %39 in 0 : vector<39x576xf32>, vector<1x576xf32> -> vector<40x576xf32>
    %c2_29 = arith.constant 2 : index
    %c0_30 = arith.constant 0 : index
    %c0_31 = arith.constant 0 : index
    %42 = vector.load %arg6[%c2_29, %c0_30, %c0_31] : memref<3x576x144xf32, #tpu.memory_space<vmem>>, vector<1x576x144xf32>
    %43 = vector.shape_cast %42 : vector<1x576x144xf32> to vector<576x144xf32>
    %cst_32 = arith.constant dense<0.000000e+00> : vector<40x144xf32>
    %44 = tpu.matmul %41, %43, %cst_32 {dimension_numbers = #tpu.dot_dimension_numbers<[1], [0], [0], [1], [0, 0, 1, 1], [], []>} : vector<40x576xf32>, vector<576x144xf32>, vector<40x144xf32> -> vector<40x144xf32>
    %45 = arith.addf %38, %44 : vector<40x144xf32>
    %c0_33 = arith.constant 0 : index
    %c0_34 = arith.constant 0 : index
    %46 = vector.load %arg7[%c0_33, %c0_34] : memref<1x144xf32, #tpu.memory_space<vmem>>, vector<1x144xf32>
    %47 = vector.broadcast %46 : vector<1x144xf32> to vector<40x144xf32>
    %48 = arith.addf %45, %47 : vector<40x144xf32>
    %c0_35 = arith.constant 0 : index
    %c0_36 = arith.constant 0 : index
    %49 = vector.load %arg8[%c0_35, %c0_36] : memref<40x144xf32, #tpu.memory_space<vmem>>, vector<40x144xf32>
    tpu.vector_store %arg8[%c0_35, %c0_36], %48 {strides = array<i32>} : memref<40x144xf32, #tpu.memory_space<vmem>>, vector<40x144xf32>,
    return
  }
  func.func @transform_0(%arg0: i32) -> (i32, i32) {
    %c0_i32 = arith.constant 0 : i32
    %c0_i32_0 = arith.constant 0 : i32
    %c0_i32_1 = arith.constant 0 : i32
    return %c0_i32, %c0_i32_0 : i32, i32
  }
  func.func @transform_1(%arg0: i32) -> (i32, i32, i32) {
    %c0_i32 = arith.constant 0 : i32
    %c0_i32_0 = arith.constant 0 : i32
    %c0_i32_1 = arith.constant 0 : i32
    %c0_i32_2 = arith.constant 0 : i32
    return %c0_i32, %c0_i32_0, %c0_i32_1 : i32, i32, i32
  }
  func.func @transform_2(%arg0: i32) -> (i32, i32) {
    %c0_i32 = arith.constant 0 : i32
    %c0_i32_0 = arith.constant 0 : i32
    %c0_i32_1 = arith.constant 0 : i32
    return %c0_i32, %c0_i32_0 : i32, i32
  }
  func.func @transform_3(%arg0: i32) -> (i32, i32) {
    %c0_i32 = arith.constant 0 : i32
    %c0_i32_0 = arith.constant 0 : i32
    %c0_i32_1 = arith.constant 0 : i32
    return %c0_i32, %c0_i32_0 : i32, i32
  }
  func.func @transform_4(%arg0: i32) -> (i32, i32) {
    %c0_i32 = arith.constant 0 : i32
    %c0_i32_0 = arith.constant 0 : i32
    %c0_i32_1 = arith.constant 0 : i32
    return %c0_i32, %c0_i32_0 : i32, i32
  }
  func.func @transform_5(%arg0: i32) -> (i32, i32, i32) {
    %c0_i32 = arith.constant 0 : i32
    %c0_i32_0 = arith.constant 0 : i32
    %c0_i32_1 = arith.constant 0 : i32
    %c0_i32_2 = arith.constant 0 : i32
    return %c0_i32, %c0_i32_0, %c0_i32_1 : i32, i32, i32
  }
  func.func @transform_6(%arg0: i32) -> (i32, i32) {
    %c0_i32 = arith.constant 0 : i32
    %c0_i32_0 = arith.constant 0 : i32
    %c0_i32_1 = arith.constant 0 : i32
    return %c0_i32, %c0_i32_0 : i32, i32
  }
  func.func @transform_7(%arg0: i32) -> (i32, i32) {
    %c0_i32 = arith.constant 0 : i32
    %c0_i32_0 = arith.constant 0 : i32
    %c0_i32_1 = arith.constant 0 : i32
    return %c0_i32, %c0_i32_0 : i32, i32
  }
}

</mosaic_0001>

<bundles_post_ra>
// kernel: bnet_forward.1
= control target key start
LH: loop header
LB: loop body
LE: loop exit
PB: predicated region body
PF: predicated region fallthrough
CT: control target
= control target key end

     0   :  { %v6558_v3 = vmov 0.0   ;;  %v4097_v47 = vmov 0   ;;  %vm82_vm0 = vcmask 1040384   ;;  %vm139_vm1 = vcmask 588800   ;;  %s6550_s1 = inlined_call_operand.vmem [shape: f32[3,72,576], index: 1, kind: input, shape index: {}]   ;;  %s6551_s0 = inlined_call_operand.vmem [shape: f32[40,72], index: 0, kind: input, shape index: {}]   ;;  %s6552_s3 = inlined_call_operand.vmem [shape: f32[40,1], index: 3, kind: input, shape index: {}]   ;;  %s6553_s5 = inlined_call_operand.vmem [shape: f32[3,576,144], index: 5, kind: input, shape index: {}]   ;;  %s6554_s2 = inlined_call_operand.vmem [shape: f32[1,576], index: 2, kind: input, shape index: {}]   ;;  %s6555_s4 = inlined_call_operand.vmem [shape: f32[1,576], index: 4, kind: input, shape index: {}]   ;;  %s6556_s6 = inlined_call_operand.vmem [shape: f32[1,144], index: 6, kind: input, shape index: {}]   ;;  %s6557_s7 = inlined_call_operand.vmem [shape: f32[40,144], index: 7, kind: output, shape index: {}]  }
   0x1   :  { %v95_v0 = vld [vmem:[%s6550_s1 + $0x8] sm:$0xff]  ;;  %v100_v1 = vld [vmem:[%s6550_s1 + $0x30] sm:$0xff]  ;;  %v2818_v2 = vld [vmem:[%s6550_s1 + $0x180] sm:$0xff]  ;;  %215 = vmatprep.mubr.f32.mxu0 %v6558_v3  ;;  %600 = vmatprep.mubr.f32.mxu1 %v6558_v3  ;;  %vm4099_vm2 = vmmov 0   ;;  %vm721_vm3 = vcmask 1046528   ;;  %vm1664_vm5 = vcmask 523264  }
   0x2   :  { %v3406_v4 = vpack.c.bf16 %v100_v1, %v95_v0  ;;  %v2823_v5 = vld [vmem:[%s6550_s1 + $0x1a8] sm:$0xff]  ;;  %v94_v6 = vld [vmem:[%s6550_s1] sm:$0xff]  ;;  %v2817_v10 = vld [vmem:[%s6550_s1 + $0x178] sm:$0xff]  ;;  %4094 = vset.pattern.permute.xlu0 %v4097_v47  ;;  %4095 = vset.pattern.permute.xlu1 %v4097_v47  ;;  %vm2801_vm6 = vcmask 130048  }
   0x3   :  { %v99_v7 = vld [vmem:[%s6550_s1 + $0x28] sm:$0xff]  ;;  %v3466_v8 = vpack.c.bf16 %v2823_v5, %v2818_v2  ;;  %v2822_v11 = vld [vmem:[%s6550_s1 + $0x1a0] sm:$0xff]  ;;  %v105_v12 = vld [vmem:[%s6550_s1 + $0x58] sm:$0xff] }
   0x4   :  { %v3408_v9 = vpack.c.bf16 %v99_v7, %v94_v6  ;;  %3407 = vmatprep.subr.bf16.mxu0 %v3406_v4  ;;  %v3468_v13 = vpack.c.bf16 %v2822_v11, %v2817_v10  ;;  %v110_v14 = vld [vmem:[%s6550_s1 + $0x80] sm:$0xff]  ;;  %v2828_v15 = vld [vmem:[%s6550_s1 + $0x1d0] sm:$0xff]  ;;  %v2833_v16 = vld [vmem:[%s6550_s1 + $0x1f8] sm:$0xff] }
   0x5   :  { %3467 = vmatprep.subr.bf16.mxu1 %v3466_v8  ;;  %v3410_v17 = vpack.c.bf16 %v110_v14, %v105_v12  ;;  %v3470_v18 = vpack.c.bf16 %v2833_v16, %v2828_v15  ;;  %v104_v19 = vld [vmem:[%s6550_s1 + $0x50] sm:$0xff]  ;;  %v109_v20 = vld [vmem:[%s6550_s1 + $0x78] sm:$0xff]  ;;  %v2827_v21 = vld [vmem:[%s6550_s1 + $0x1c8] sm:$0xff]  ;;  %v4098_v15 = vmov 0.0|0.0  }
   0x6   :  { %3409 = vmatpush1.bf16.msra.mxu0 %v3408_v9  ;;  %3469 = vmatpush1.bf16.msra.mxu1 %v3468_v13  ;;  %v3412_v22 = vpack.c.bf16 %v109_v20, %v104_v19  ;;  %v2832_v23 = vld [vmem:[%s6550_s1 + $0x1f0] sm:$0xff]  ;;  %v115_v24 = vld [vmem:[%s6550_s1 + $0xa8] sm:$0xff]  ;;  %v2838_v28 = vld [vmem:[%s6550_s1 + $0x220] sm:$0xff] }
   0x7   :  { %v120_v25 = vld [vmem:[%s6550_s1 + $0xd0] sm:$0xff]  ;;  %3411 = vmatprep.subr.bf16.mxu0 %v3410_v17  ;;  %3471 = vmatprep.subr.bf16.mxu1 %v3470_v18  ;;  %v3472_v26 = vpack.c.bf16 %v2832_v23, %v2827_v21  ;;  %v2843_v29 = vld [vmem:[%s6550_s1 + $0x248] sm:$0xff]  ;;  %v114_v30 = vld [vmem:[%s6550_s1 + $0xa0] sm:$0xff] }
   0x8   :  { %v3414_v27 = vpack.c.bf16 %v120_v25, %v115_v24  ;;  %v3474_v31 = vpack.c.bf16 %v2843_v29, %v2838_v28  ;;  %v119_v32 = vld [vmem:[%s6550_s1 + $0xc8] sm:$0xff]  ;;  %v2837_v33 = vld [vmem:[%s6550_s1 + $0x218] sm:$0xff]  ;;  %v2842_v34 = vld [vmem:[%s6550_s1 + $0x240] sm:$0xff] }
   0x9   :  { %v3416_v35 = vpack.c.bf16 %v119_v32, %v114_v30  ;;  %v125_v36 = vld [vmem:[%s6550_s1 + $0xf8] sm:$0xff]  ;;  %v130_v37 = vld [vmem:[%s6550_s1 + $0x120] sm:$0xff]  ;;  %v2848_v38 = vld [vmem:[%s6550_s1 + $0x270] sm:$0xff]  ;;  %v3476_v39 = vpack.c.bf16 %v2842_v34, %v2837_v33 }
   0xa   :  { %3413 = vmatpush1.bf16.msra.mxu0 %v3412_v22  ;;  %3473 = vmatpush1.bf16.msra.mxu1 %v3472_v26  ;;  %v3418_v40 = vpack.c.bf16 %v130_v37, %v125_v36  ;;  %v2853_v41 = vld [vmem:[%s6550_s1 + $0x298] sm:$0xff]  ;;  %v124_v42 = vld [vmem:[%s6550_s1 + $0xf0] sm:$0xff]  ;;  %v2847_v45 = vld [vmem:[%s6550_s1 + $0x268] sm:$0xff] }
   0xb   :  { %3415 = vmatprep.subr.bf16.mxu0 %v3414_v27  ;;  %v129_v43 = vld [vmem:[%s6550_s1 + $0x118] sm:$0xff]  ;;  %3475 = vmatprep.subr.bf16.mxu1 %v3474_v31  ;;  %v3478_v44 = vpack.c.bf16 %v2853_v41, %v2848_v38  ;;  %v2852_v46 = vld [vmem:[%s6550_s1 + $0x290] sm:$0xff]  ;;  %v4241_v49 = vld [vmem:[%s6551_s0] sm:$0xff] }
   0xc   :  { %v3420_v48 = vpack.c.bf16 %v129_v43, %v124_v42  ;;  %v3480_v50 = vpack.c.bf16 %v2852_v46, %v2847_v45  ;;  %v135_v51 = vld [vmem:[%s6550_s1 + $0x148] sm:$0xff]  ;;  %v2858_v52 = vld [vmem:[%s6550_s1 + $0x2c0] sm:$0xff]  ;;  %v83_v53 = vrot.slane %v4241_v49, 7  ;;  %v97_v54 = vld [vmem:[%s6550_s1 + $0x18] sm:$0xff] }
   0xd   :  { %v102_v55 = vld [vmem:[%s6550_s1 + $0x40] sm:$0xff]  ;;  %v4259_v56 = vld [vmem:[%s6551_s0 + $0x8] sm:$0xff]  ;;  %v96_v57 = vld [vmem:[%s6550_s1 + $0x10] sm:$0xff] }
   0xe   :  { %3417 = vmatpush1.bf16.msra.mxu0 %v3416_v35  ;;  %3477 = vmatpush1.bf16.msra.mxu1 %v3476_v39  ;;  %v101_v58 = vld [vmem:[%s6550_s1 + $0x38] sm:$0xff]  ;;  %v134_v59 = vld [vmem:[%s6550_s1 + $0x140] sm:$0xff]  ;;  %v4274_v61 = vsel %vm82_vm0, 0.0, %v83_v53  ;;  %v3422_v62 = vpack.c.bf16 %v102_v55, %v97_v54  ;;  %v2819_v63 = vld [vmem:[%s6550_s1 + $0x188] sm:$0xff]  ;;  %v84_v1 = vrot.slane %v4259_v56, 7 }
   0xf   :  { %3419 = vmatprep.subr.bf16.mxu0 %v3418_v40  ;;  %3479 = vmatprep.subr.bf16.mxu1 %v3478_v44  ;;  %v2857_v60 = vld [vmem:[%s6550_s1 + $0x2b8] sm:$0xff]  ;;  %v2824_v0 = vld [vmem:[%s6550_s1 + $0x1b0] sm:$0xff]  ;;  %v3424_v2 = vpack.c.bf16 %v101_v58, %v96_v57  ;;  %v107_v4 = vld [vmem:[%s6550_s1 + $0x68] sm:$0xff] }
  0x10   :  { %v112_v5 = vld [vmem:[%s6550_s1 + $0x90] sm:$0xff]  ;;  %v106_v7 = vld [vmem:[%s6550_s1 + $0x60] sm:$0xff]  ;;  %v111_v8 = vld [vmem:[%s6550_s1 + $0x88] sm:$0xff]  ;;  %v3483_v9 = vpack.c.bf16 %v2824_v0, %v2819_v63  ;;  %v4305_v10 = vsel %vm82_vm0, %v83_v53, %v84_v1 }
  0x11   :  { %v4292_v6 = vld [vmem:[%s6551_s0 + $0x10] sm:$0xff]  ;;  %v3426_v11 = vpack.c.bf16 %v112_v5, %v107_v4  ;;  %v2829_v12 = vld [vmem:[%s6550_s1 + $0x1d8] sm:$0xff]  ;;  %v2834_v13 = vld [vmem:[%s6550_s1 + $0x200] sm:$0xff]  ;;  %v3428_v16 = vpack.c.bf16 %v111_v8, %v106_v7 }
  0x12   :  { %3421 = vmatpush1.bf16.msra.mxu0 %v3420_v48  ;;  %3481 = vmatpush1.bf16.msra.mxu1 %v3480_v50  ;;  %v86_v14 = vrot.slane %v4292_v6, 7  ;;  %v117_v17 = vld [vmem:[%s6550_s1 + $0xb8] sm:$0xff]  ;;  %v122_v18 = vld [vmem:[%s6550_s1 + $0xe0] sm:$0xff]  ;;  %v116_v20 = vld [vmem:[%s6550_s1 + $0xb0] sm:$0xff]  ;;  %v3486_v22 = vpack.c.bf16 %v2834_v13, %v2829_v12 }
  0x13   :  { %167 = vmatprep.subr.mxu0 %v135_v51  ;;  %552 = vmatprep.subr.mxu1 %v2858_v52  ;;  %v4324_v19 = vld [vmem:[%s6551_s0 + $0x18] sm:$0xff]  ;;  %v3430_v24 = vpack.c.bf16 %v122_v18, %v117_v17  ;;  %v2839_v25 = vld [vmem:[%s6550_s1 + $0x228] sm:$0xff]  ;;  %v2844_v26 = vld [vmem:[%s6550_s1 + $0x250] sm:$0xff] }
  0x14   :  { %v121_v21 = vld [vmem:[%s6550_s1 + $0xd8] sm:$0xff]  ;;  %v4339_v23 = vsel %vm82_vm0, %v84_v1, %v86_v14  ;;  %v88_v27 = vrot.slane %v4324_v19, 7  ;;  %v127_v29 = vld [vmem:[%s6550_s1 + $0x108] sm:$0xff]  ;;  %v132_v30 = vld [vmem:[%s6550_s1 + $0x130] sm:$0xff]  ;;  %v3489_v34 = vpack.c.bf16 %v2844_v26, %v2839_v25 }
  0x15   :  { %v3432_v28 = vpack.c.bf16 %v121_v21, %v116_v20  ;;  %v4358_v31 = vld [vmem:[%s6551_s0 + $0x20] sm:$0xff]  ;;  %v131_v33 = vld [vmem:[%s6550_s1 + $0x128] sm:$0xff]  ;;  %v3434_v36 = vpack.c.bf16 %v132_v30, %v127_v29  ;;  %v2849_v37 = vld [vmem:[%s6550_s1 + $0x278] sm:$0xff]  ;;  %v722_v30 = vrot.slane %v4241_v49, 1 }
  0x16   :  { %168 = vmatpush1.msra.mxu0 %v134_v59  ;;  %553 = vmatpush1.msra.mxu1 %v2857_v60  ;;  %v126_v32 = vld [vmem:[%s6550_s1 + $0x100] sm:$0xff]  ;;  %v4373_v35 = vsel %vm82_vm0, %v86_v14, %v88_v27  ;;  %v90_v39 = vrot.slane %v4358_v31, 7  ;;  %v137_v43 = vld [vmem:[%s6550_s1 + $0x158] sm:$0xff]  ;;  %v136_v44 = vld [vmem:[%s6550_s1 + $0x150] sm:$0xff] }
  0x17   :  { %2860 = vmatmul.mubr.msk.f32.vlgmr.msra.gmra.mrb[0].mxu0 %vm139_vm1, %v4274_v61  ;;  %3423 = vmatprep.subr.bf16.mxu0 %v3422_v62  ;;  %v2854_v38 = vld [vmem:[%s6550_s1 + $0x2a0] sm:$0xff]  ;;  %v3436_v40 = vpack.c.bf16 %v131_v33, %v126_v32  ;;  %v103_v46 = vld [vmem:[%s6550_s1 + $0x48] sm:$0xff]  ;;  %v2898_v48 = vld [vmem:[%s6550_s1 + $0x310] sm:$0xff]  ;;  %v723_v32 = vrot.slane %v4259_v56, 1 }
  0x18   :  { %2880 = vmatmul.mubr.msk.f32.vlgmr.msra.gmra.mrb[0].mxu1 %vm139_vm1, %v4241_v49  ;;  %3425 = vmatpush1.bf16.msra.mxu0 %v3424_v2  ;;  %v3492_v41 = vpack.c.bf16 %v2854_v38, %v2849_v37  ;;  %v4390_v42 = vsel %vm82_vm0, %v88_v27, %v90_v39  ;;  %v98_v45 = vld [vmem:[%s6550_s1 + $0x20] sm:$0xff]  ;;  %v2893_v47 = vld [vmem:[%s6550_s1 + $0x2e8] sm:$0xff]  ;;  %v108_v55 = vld [vmem:[%s6550_s1 + $0x70] sm:$0xff] }
  0x19   :  { %3482 = vmatprep.subr.bf16.mxu1 %v4098_v15  ;;  %221 = vmatprep.mubr.f32.mxu0 %v6558_v3  ;;  %v2859_v50 = vld [vmem:[%s6550_s1 + $0x2c8] sm:$0xff]  ;;  %v2892_v51 = vld [vmem:[%s6550_s1 + $0x2e0] sm:$0xff]  ;;  %v3439_v53 = vpack.c.bf16 %v103_v46, %v98_v45  ;;  %v3510_v54 = vpack.c.bf16 %v2898_v48, %v2893_v47  ;;  %v113_v57 = vld [vmem:[%s6550_s1 + $0x98] sm:$0xff] }
  0x1a   :  { %606 = vmatprep.mubr.f32.mxu1 %v6558_v3  ;;  %3484 = vmatpush3.bf16.msra.mxu1 %v3483_v9  ;;  %v2897_v52 = vld [vmem:[%s6550_s1 + $0x308] sm:$0xff]  ;;  %v2903_v58 = vld [vmem:[%s6550_s1 + $0x338] sm:$0xff]  ;;  %v2908_v59 = vld [vmem:[%s6550_s1 + $0x360] sm:$0xff]  ;;  %v3442_v0 = vpack.c.bf16 %v113_v57, %v108_v55 }
  0x1b   :  { %2861 = vmatmul.mubr.msk.f32.gmra.mrb[2].mxu0 %vm139_vm1, %v4305_v10  ;;  %3427 = vmatprep.subr.bf16.mxu0 %v3426_v11  ;;  %v3512_v60 = vpack.c.bf16 %v2897_v52, %v2892_v51  ;;  %v2902_v62 = vld [vmem:[%s6550_s1 + $0x330] sm:$0xff]  ;;  %v2907_v63 = vld [vmem:[%s6550_s1 + $0x358] sm:$0xff]  ;;  %v3514_v1 = vpack.c.bf16 %v2908_v59, %v2903_v58  ;;  %v118_v2 = vld [vmem:[%s6550_s1 + $0xc0] sm:$0xff] }
  0x1c   :  { %2881 = vmatmul.mubr.msk.f32.gmra.mrb[2].mxu1 %vm139_vm1, %v4259_v56  ;;  %3429 = vmatpush1.bf16.msra.mxu0 %v3428_v16  ;;  %v123_v4 = vld [vmem:[%s6550_s1 + $0xe8] sm:$0xff]  ;;  %v2918_v7 = vld [vmem:[%s6550_s1 + $0x3b0] sm:$0xff]  ;;  %v3516_v8 = vpack.c.bf16 %v2907_v63, %v2902_v62  ;;  %v2912_v9 = vld [vmem:[%s6550_s1 + $0x380] sm:$0xff] }
  0x1d   :  { %3485 = vmatprep.subr.bf16.mxu1 %v4098_v15  ;;  %227 = vmatprep.mubr.f32.mxu0 %v6558_v3  ;;  %v2913_v5 = vld [vmem:[%s6550_s1 + $0x388] sm:$0xff]  ;;  %v3445_v12 = vpack.c.bf16 %v123_v4, %v118_v2  ;;  %v128_v14 = vld [vmem:[%s6550_s1 + $0x110] sm:$0xff]  ;;  %v133_v16 = vld [vmem:[%s6550_s1 + $0x138] sm:$0xff] }
  0x1e   :  { %612 = vmatprep.mubr.f32.mxu1 %v6558_v3  ;;  %3487 = vmatpush3.bf16.msra.mxu1 %v3486_v22  ;;  %v2917_v11 = vld [vmem:[%s6550_s1 + $0x3a8] sm:$0xff]  ;;  %v3518_v13 = vpack.c.bf16 %v2918_v7, %v2913_v5  ;;  %v2923_v17 = vld [vmem:[%s6550_s1 + $0x3d8] sm:$0xff]  ;;  %v2928_v18 = vld [vmem:[%s6550_s1 + $0x400] sm:$0xff] }
  0x1f   :  { %2862 = vmatmul.mubr.msk.f32.gmra.mrb[4].mxu0 %vm139_vm1, %v4339_v23  ;;  %3431 = vmatprep.subr.bf16.mxu0 %v3430_v24  ;;  %v3520_v20 = vpack.c.bf16 %v2917_v11, %v2912_v9  ;;  %v2922_v21 = vld [vmem:[%s6550_s1 + $0x3d0] sm:$0xff]  ;;  %v2927_v22 = vld [vmem:[%s6550_s1 + $0x3f8] sm:$0xff]  ;;  %v3448_v24 = vpack.c.bf16 %v133_v16, %v128_v14  ;;  %v3522_v25 = vpack.c.bf16 %v2928_v18, %v2923_v17  ;;  %v138_v27 = vld [vmem:[%s6550_s1 + $0x160] sm:$0xff] }
  0x20   :  { %2882 = vmatmul.mubr.msk.f32.gmra.mrb[4].mxu1 %vm139_vm1, %v4292_v6  ;;  %3433 = vmatpush1.bf16.msra.mxu0 %v3432_v28  ;;  %v3524_v26 = vpack.c.bf16 %v2927_v22, %v2922_v21  ;;  %v2816_v28 = vld [vmem:[%s6550_s1 + $0x170] sm:$0xff]  ;;  %v2821_v29 = vld [vmem:[%s6550_s1 + $0x198] sm:$0xff]  ;;  %v2933_v33 = vld [vmem:[%s6550_s1 + $0x428] sm:$0xff] }
  0x21   :  { %3488 = vmatprep.subr.bf16.mxu1 %v4098_v15  ;;  %233 = vmatprep.mubr.f32.mxu0 %v6558_v3  ;;  %v2826_v37 = vld [vmem:[%s6550_s1 + $0x1c0] sm:$0xff]  ;;  %v2831_v38 = vld [vmem:[%s6550_s1 + $0x1e8] sm:$0xff]  ;;  %v2825_v46 = vld [vmem:[%s6550_s1 + $0x1b8] sm:$0xff] }
  0x22   :  { %618 = vmatprep.mubr.f32.mxu1 %v6558_v3  ;;  %3490 = vmatpush3.bf16.msra.mxu1 %v3489_v34  ;;  %v2815_v34 = vld [vmem:[%s6550_s1 + $0x168] sm:$0xff]  ;;  %v2932_v39 = vld [vmem:[%s6550_s1 + $0x420] sm:$0xff]  ;;  %v3454_v45 = vpack.c.bf16 %v2831_v38, %v2826_v37  ;;  %v2836_v48 = vld [vmem:[%s6550_s1 + $0x210] sm:$0xff] }
  0x23   :  { %2863 = vmatmul.mubr.msk.f32.gmra.mrb[6].mxu0 %vm139_vm1, %v4373_v35  ;;  %3435 = vmatprep.subr.bf16.mxu0 %v3434_v36  ;;  %v2820_v36 = vld [vmem:[%s6550_s1 + $0x190] sm:$0xff]  ;;  %v2830_v47 = vld [vmem:[%s6550_s1 + $0x1e0] sm:$0xff]  ;;  %v2835_v55 = vld [vmem:[%s6550_s1 + $0x208] sm:$0xff] }
  0x24   :  { %2883 = vmatmul.mubr.msk.f32.gmra.mrb[6].mxu1 %vm139_vm1, %v4324_v19  ;;  %3437 = vmatpush1.bf16.msra.mxu0 %v3436_v40  ;;  %v3450_v40 = vpack.c.bf16 %v2821_v29, %v2816_v28  ;;  %v1172_v51 = vld [vmem:[%s6552_s3] sm:$0xff]  ;;  %v3456_v52 = vpack.c.bf16 %v2830_v47, %v2825_v46  ;;  %v2840_v57 = vld [vmem:[%s6550_s1 + $0x230] sm:$0xff]  ;;  %v2851_v59 = vld [vmem:[%s6550_s1 + $0x288] sm:$0xff] }
  0x25   :  { %3491 = vmatprep.subr.bf16.mxu1 %v4098_v15  ;;  %239 = vmatprep.mubr.f32.mxu0 %v6558_v3  ;;  %v2846_v58 = vld [vmem:[%s6550_s1 + $0x260] sm:$0xff]  ;;  %v3460_v63 = vpack.c.bf16 %v2840_v57, %v2835_v55  ;;  %v2845_v2 = vld [vmem:[%s6550_s1 + $0x258] sm:$0xff]  ;;  %v2856_v9 = vld [vmem:[%s6550_s1 + $0x2b0] sm:$0xff] }
  0x26   :  { %624 = vmatprep.mubr.f32.mxu1 %v6558_v3  ;;  %3493 = vmatpush3.bf16.msra.mxu1 %v3492_v41  ;;  %v4551_v41 = vsel %vm721_vm3, %v722_v30, %v723_v32  ;;  %v2850_v4 = vld [vmem:[%s6550_s1 + $0x280] sm:$0xff]  ;;  %v1175_v5 = vld [vmem:[%s6552_s3 + $0x18] sm:$0xff]  ;;  %v2855_v16 = vld [vmem:[%s6550_s1 + $0x2a8] sm:$0xff] }
  0x27   :  { %2864 = vmatmul.mubr.msk.f32.gmra.mrb[8].mxu0 %vm139_vm1, %v4390_v42  ;;  %262 = vmatprep.subr.mxu0 %v137_v43  ;;  %v3452_v43 = vpack.c.bf16 %v2820_v36, %v2815_v34  ;;  %v1176_v7 = vld [vmem:[%s6552_s3 + $0x20] sm:$0xff]  ;;  %v2891_v11 = vld [vmem:[%s6550_s1 + $0x2d8] sm:$0xff]  ;;  %v2901_v18 = vld [vmem:[%s6550_s1 + $0x328] sm:$0xff] }
  0x28   :  { %2884 = vmatmul.mubr.msk.f32.gmra.mrb[8].mxu1 %vm139_vm1, %v4358_v31  ;;  %263 = vmatpush1.msra.mxu0 %v136_v44  ;;  %v725_v44 = vrot.slane %v4292_v6, 1  ;;  %v2895_v14 = vld [vmem:[%s6550_s1 + $0x2f8] sm:$0xff]  ;;  %v2910_v29 = vld [vmem:[%s6550_s1 + $0x370] sm:$0xff]  ;;  %v2920_v36 = vld [vmem:[%s6550_s1 + $0x3c0] sm:$0xff] }
  0x29   :  { %3356 = vmatprep.subr.mxu1 %v6558_v3  ;;  %310 = vmatprep.mubr.f32.mxu0 %v6558_v3  ;;  %v2915_v30 = vld [vmem:[%s6550_s1 + $0x398] sm:$0xff]  ;;  %v2925_v37 = vld [vmem:[%s6550_s1 + $0x3e8] sm:$0xff]  ;;  %vm5188_vm4 = vmneg %vm82_vm0 }
  0x2a   :  { %3358 = vmatprep.mubr.msk.f32.mxu1 %vm4099_vm2, %v6558_v3  ;;  %3357 = vmatpush3.msra.mxu1 %v2859_v50  ;;  %v2841_v50 = vld [vmem:[%s6550_s1 + $0x238] sm:$0xff]  ;;  %v1525_v57 = vld [vmem:[%s6553_s5 + $0x28] sm:$0xff] }
  0x2b   :  { %2865 = vmatmul.mubr.msk.f32.vlgmr.msra.gmra.mrb[10].mxu0 %vm139_vm1, %v4274_v61  ;;  %3438 = vmatprep.subr.bf16.mxu0 %v4098_v15  ;;  %v2931_v38 = vld [vmem:[%s6550_s1 + $0x418] sm:$0xff] }
  0x2c   :  { %3359 = vmatmul.mubr.msk.f32.vlgmr.msra.gmra.mrb[10].mxu1 %vm139_vm1, %v4241_v49  ;;  %3440 = vmatpush3.bf16.msra.mxu0 %v3439_v53  ;;  %v727_v53 = vrot.slane %v4324_v19, 1  ;;  %v2919_v46 = vld [vmem:[%s6550_s1 + $0x3b8] sm:$0xff] }
  0x2d   :  { %3511 = vmatprep.subr.bf16.mxu1 %v3510_v54  ;;  %316 = vmatprep.mubr.f32.mxu0 %v6558_v3  ;;  %v3458_v54 = vpack.c.bf16 %v2841_v50, %v2836_v48  ;;  %v2924_v48 = vld [vmem:[%s6550_s1 + $0x3e0] sm:$0xff]  ;;  %v2929_v50 = vld [vmem:[%s6550_s1 + $0x408] sm:$0xff] }
  0x2e   :  { %3361 = vmatprep.mubr.msk.f32.mxu1 %vm4099_vm2, %v6558_v3  ;;  %3513 = vmatpush1.bf16.msra.mxu1 %v3512_v60  ;;  %v1174_v60 = vld [vmem:[%s6552_s3 + $0x10] sm:$0xff]  ;;  %v4609_v62 = vsel %vm721_vm3, %v725_v44, %v727_v53 }
  0x2f   :  { %2866 = vmatmul.mubr.msk.f32.gmra.mrb[12].mxu0 %vm139_vm1, %v4305_v10  ;;  %3441 = vmatprep.subr.bf16.mxu0 %v4098_v15 }
  0x30   :  { %3362 = vmatmul.mubr.msk.f32.gmra.mrb[12].mxu1 %vm139_vm1, %v4259_v56  ;;  %3443 = vmatpush3.bf16.msra.mxu0 %v3442_v0  ;;  %v729_v0 = vrot.slane %v4358_v31, 1 }
  0x31   :  { %3515 = vmatprep.subr.bf16.mxu1 %v3514_v1  ;;  %322 = vmatprep.mubr.f32.mxu0 %v6558_v3  ;;  %v3462_v1 = vpack.c.bf16 %v2851_v59, %v2846_v58  ;;  %v1527_v58 = vld [vmem:[%s6553_s5 + $0x38] sm:$0xff] }
  0x32   :  { %3364 = vmatprep.mubr.msk.f32.mxu1 %vm4099_vm2, %v6558_v3  ;;  %3517 = vmatpush1.bf16.msra.mxu1 %v3516_v8  ;;  %v3464_v8 = vpack.c.bf16 %v2850_v4, %v2845_v2  ;;  %v3542_v59 = vpack.c.bf16 %v1527_v58, %v1525_v57  ;;  %v1528_v2 = vld [vmem:[%s6553_s5 + $0x40] sm:$0xff]  ;;  %v1530_v4 = vld [vmem:[%s6553_s5 + $0x50] sm:$0xff] }
  0x33   :  { %2867 = vmatmul.mubr.msk.f32.gmra.mrb[14].mxu0 %vm139_vm1, %v4339_v23  ;;  %3444 = vmatprep.subr.bf16.mxu0 %v4098_v15  ;;  %v1560_v58 = vld [vmem:[%s6553_s5 + $0x140] sm:$0xff] }
  0x34   :  { %3365 = vmatmul.mubr.msk.f32.gmra.mrb[14].mxu1 %vm139_vm1, %v4292_v6  ;;  %3446 = vmatpush3.bf16.msra.mxu0 %v3445_v12  ;;  %v2896_v12 = vld [vmem:[%s6550_s1 + $0x300] sm:$0xff] }
  0x35   :  { %3519 = vmatprep.subr.bf16.mxu1 %v3518_v13  ;;  %328 = vmatprep.mubr.f32.mxu0 %v6558_v3  ;;  %v2890_v13 = vld [vmem:[%s6550_s1 + $0x2d0] sm:$0xff]  ;;  %v3494_v17 = vpack.c.bf16 %v2896_v12, %v2891_v11  ;;  %v1532_v11 = vld [vmem:[%s6553_s5 + $0x60] sm:$0xff] }
  0x36   :  { %3367 = vmatprep.mubr.msk.f32.mxu1 %vm4099_vm2, %v6558_v3  ;;  %3521 = vmatpush1.bf16.msra.mxu1 %v3520_v20  ;;  %v2906_v20 = vld [vmem:[%s6550_s1 + $0x350] sm:$0xff]  ;;  %v3496_v21 = vpack.c.bf16 %v2895_v14, %v2890_v13 }
  0x37   :  { %2868 = vmatmul.mubr.msk.f32.gmra.mrb[16].mxu0 %vm139_vm1, %v4373_v35  ;;  %3447 = vmatprep.subr.bf16.mxu0 %v4098_v15  ;;  %v3498_v22 = vpack.c.bf16 %v2906_v20, %v2901_v18  ;;  %v1534_v12 = vld [vmem:[%s6553_s5 + $0x70] sm:$0xff]  ;;  %v4851_v18 = vld [vmem:[%s6554_s2] sm:$0x1f] }
  0x38   :  { %3368 = vmatmul.mubr.msk.f32.gmra.mrb[16].mxu1 %vm139_vm1, %v4324_v19  ;;  %3449 = vmatpush3.bf16.msra.mxu0 %v3448_v24  ;;  %v2900_v24 = vld [vmem:[%s6550_s1 + $0x320] sm:$0xff] }
  0x39   :  { %3523 = vmatprep.subr.bf16.mxu1 %v3522_v25  ;;  %334 = vmatprep.mubr.f32.mxu0 %v6558_v3  ;;  %v2905_v25 = vld [vmem:[%s6550_s1 + $0x348] sm:$0xff] }
  0x3a   :  { %3370 = vmatprep.mubr.msk.f32.mxu1 %vm4099_vm2, %v6558_v3  ;;  %3525 = vmatpush1.bf16.msra.mxu1 %v3524_v26  ;;  %v2916_v26 = vld [vmem:[%s6550_s1 + $0x3a0] sm:$0xff] }
  0x3b   :  { %2869 = vmatmul.mubr.msk.f32.gmra.mrb[18].mxu0 %vm139_vm1, %v4390_v42  ;;  %3323 = vmatprep.subr.mxu0 %v6558_v3 }
  0x3c   :  { %3371 = vmatmul.mubr.msk.f32.gmra.mrb[18].mxu1 %vm139_vm1, %v4358_v31  ;;  %3324 = vmatpush3.msra.mxu0 %v138_v27  ;;  %v3500_v27 = vpack.c.bf16 %v2905_v25, %v2900_v24 }
  0x3d   :  { %901 = vmatprep.subr.mxu1 %v2933_v33  ;;  %3325 = vmatprep.mubr.msk.f32.mxu0 %vm4099_vm2, %v6558_v3  ;;  %v3504_v33 = vpack.c.bf16 %v2915_v30, %v2910_v29  ;;  %v1540_v30 = vld [vmem:[%s6553_s5 + $0xa0] sm:$0xff] }
  0x3e   :  { %949 = vmatprep.mubr.f32.mxu1 %v6558_v3  ;;  %902 = vmatpush1.msra.mxu1 %v2932_v39  ;;  %v2894_v39 = vld [vmem:[%s6550_s1 + $0x2f0] sm:$0xff] }
  0x3f   :  { %3326 = vmatmul.mubr.msk.f32.vlgmr.msra.gmra.mrb[20].mxu0 %vm139_vm1, %v4274_v61  ;;  %3451 = vmatprep.subr.bf16.mxu0 %v3450_v40  ;;  %v4579_v61 = vsel %vm721_vm3, %v723_v32, %v725_v44  ;;  %v2921_v32 = vld [vmem:[%s6550_s1 + $0x3c8] sm:$0xff]  ;;  %v2899_v40 = vld [vmem:[%s6550_s1 + $0x318] sm:$0xff] }
  0x40   :  { %2940 = vmatmul.mubr.msk.f32.vlgmr.msra.gmra.mrb[0].mxu1 %vm139_vm1, %v4551_v41  ;;  %3453 = vmatpush1.bf16.msra.mxu0 %v3452_v43  ;;  %v2904_v43 = vld [vmem:[%s6550_s1 + $0x340] sm:$0xff]  ;;  %v2909_v44 = vld [vmem:[%s6550_s1 + $0x368] sm:$0xff] }
  0x41   :  { %3328 = vmatprep.mubr.msk.f32.mxu0 %vm4099_vm2, %v6558_v3  ;;  %955 = vmatprep.mubr.f32.mxu1 %v6558_v3 }
  0x42   :  { %3455 = vmatprep.subr.bf16.mxu0 %v3454_v45  ;;  %1180 = vperm.xlu0 %4094, %v1172_v51   ;;  %v2914_v45 = vld [vmem:[%s6550_s1 + $0x390] sm:$0xff]  ;;  %v3536_v51 = vpack.c.bf16 %v2929_v50, %v2924_v48 }
  0x43   :  { %3329 = vmatmul.mubr.msk.f32.gmra.mrb[22].mxu0 %vm139_vm1, %v4305_v10  ;;  %v1173_v10 = vld [vmem:[%s6552_s3 + $0x8] sm:$0xff]  ;;  %1190 = vperm.xlu1 %4095, %v1174_v60   ;;  %v3533_v47 = vpack.c.bf16 %v2919_v46, %v2914_v45  ;;  %v1524_v60 = vld [vmem:[%s6553_s5 + $0x20] sm:$0xff]  ;;  %v1555_v45 = vld [vmem:[%s6553_s5 + $0x118] sm:$0xff] }
  0x44   :  { %2941 = vmatmul.mubr.msk.f32.gmra.mrb[2].mxu1 %vm139_vm1, %v4579_v61  ;;  %3331 = vmatprep.mubr.msk.f32.mxu0 %vm4099_vm2, %v6558_v3  ;;  %v1554_v48 = vld [vmem:[%s6553_s5 + $0x110] sm:$0xff] }
  0x45   :  { %3457 = vmatpush1.bf16.msra.mxu0 %v3456_v52  ;;  %961 = vmatprep.mubr.f32.mxu1 %v6558_v3  ;;  %v2934_v52 = vld [vmem:[%s6550_s1 + $0x430] sm:$0xff] }
  0x46   :  { %3459 = vmatprep.subr.bf16.mxu0 %v3458_v54  ;;  %1185 = vperm.xlu0 %4094, %v1173_v10   ;;  %v1520_v54 = vld [vmem:[%s6553_s5] sm:$0xff]  ;;  %v1526_v10 = vld [vmem:[%s6553_s5 + $0x30] sm:$0xff] }
  0x47   :  { %3332 = vmatmul.mubr.msk.f32.gmra.mrb[24].mxu0 %vm139_vm1, %v4339_v23  ;;  %v4632_v23 = vsel %vm721_vm3, %v727_v53, %v729_v0  ;;  %1195 = vperm.xlu1 %4095, %v1175_v5   ;;  %v1523_v53 = vld [vmem:[%s6553_s5 + $0x18] sm:$0xff]  ;;  %v3548_v5 = vpack.c.bf16 %v1530_v4, %v1528_v2  ;;  %v1569_v2 = vld [vmem:[%s6553_s5 + $0x188] sm:$0xff] }
  0x48   :  { %2942 = vmatmul.mubr.msk.f32.gmra.mrb[4].mxu1 %vm139_vm1, %v4609_v62  ;;  %3334 = vmatprep.mubr.msk.f32.mxu0 %vm4099_vm2, %v6558_v3  ;;  %v1571_v4 = vld [vmem:[%s6553_s5 + $0x198] sm:$0xff] }
  0x49   :  { %3461 = vmatpush1.bf16.msra.mxu0 %v3460_v63  ;;  %967 = vmatprep.mubr.f32.mxu1 %v6558_v3  ;;  %v1529_v63 = vld [vmem:[%s6553_s5 + $0x48] sm:$0xff] }
  0x4a   :  { %3463 = vmatprep.subr.bf16.mxu0 %v3462_v1  ;;  %1200 = vperm.xlu0 %4094, %v1176_v7   ;;  %v1533_v7 = vld [vmem:[%s6553_s5 + $0x68] sm:$0xff] }
  0x4b   :  { %3335 = vmatmul.mubr.msk.f32.gmra.mrb[26].mxu0 %vm139_vm1, %v4373_v35  ;;  %v4651_v35 = vsel %vm721_vm3, %v729_v0, 0.0  ;;  %v1531_v0 = vld [vmem:[%s6553_s5 + $0x58] sm:$0xff] }
  0x4c   :  { %2943 = vmatmul.mubr.msk.f32.gmra.mrb[6].mxu1 %vm139_vm1, %v4632_v23  ;;  %3337 = vmatprep.mubr.msk.f32.mxu0 %vm4099_vm2, %v6558_v3  ;;  %v3546_v1 = vpack.c.bf16 %v1531_v0, %v1529_v63  ;;  %v1564_v63 = vld [vmem:[%s6553_s5 + $0x160] sm:$0xff]  ;;  %v1566_v0 = vld [vmem:[%s6553_s5 + $0x170] sm:$0xff] }
  0x4d   :  { %3465 = vmatpush1.bf16.msra.mxu0 %v3464_v8  ;;  %973 = vmatprep.mubr.f32.mxu1 %v6558_v3  ;;  %v1097_v8 = vlaneseq }
  0x4e   :  { %457 = vmatprep.subr.mxu0 %v2856_v9 }
  0x4f   :  { %3338 = vmatmul.mubr.msk.f32.gmra.mrb[28].mxu0 %vm139_vm1, %v4390_v42  ;;  %v2911_v42 = vld [vmem:[%s6550_s1 + $0x378] sm:$0xff]  ;;  %v4839_v13 = vshrl.u32 %v1097_v8, 7  ;;  %v1570_v8 = vld [vmem:[%s6553_s5 + $0x190] sm:$0xff] }
  0x50   :  { %2944 = vmatmul.mubr.msk.f32.gmra.mrb[8].mxu1 %vm139_vm1, %v4651_v35  ;;  %505 = vmatprep.mubr.f32.mxu0 %v6558_v3  ;;  %v3502_v28 = vpack.c.bf16 %v2916_v26, %v2911_v42  ;;  %v4865_v42 = vld [vmem:[%s6555_s4] sm:$0x1f] }
  0x51   :  { %458 = vmatpush1.msra.mxu0 %v2855_v16  ;;  %1930 = vmatprep.mubr.f32.mxu1 %v6558_v3  ;;  %v1107_v14 = vsub.s32 2, %v4839_v13  ;;  %v1537_v16 = vld [vmem:[%s6553_s5 + $0x88] sm:$0xff] }
  0x52   :  { %3495 = vmatprep.subr.bf16.mxu0 %v3494_v17  ;;  %v1539_v17 = vld [vmem:[%s6553_s5 + $0x98] sm:$0xff] }
  0x53   :  { %2875 = vmatmul.mubr.msk.f32.vlgmr.msra.gmra.mrb[0].mxu0 %vm139_vm1, %v4241_v49  ;;  %v2926_v49 = vld [vmem:[%s6550_s1 + $0x3f0] sm:$0xff]  ;;  %v3554_v20 = vpack.c.bf16 %v1539_v17, %v1537_v16  ;;  %v4860_v24 = vrot.slane %v4851_v18, %v1107_v14  ;;  %v4868_v26 = vrot.slane %v4865_v42, %v1107_v14  ;;  %v1572_v14 = vld [vmem:[%s6553_s5 + $0x1a0] sm:$0xff] }
  0x54   :  { %3497 = vmatpush1.bf16.msra.mxu0 %v3496_v21  ;;  %511 = vmatprep.mubr.f32.mxu0 %v6558_v3  ;;  %v3506_v34 = vpack.c.bf16 %v2926_v49, %v2921_v32  ;;  %v1536_v21 = vld [vmem:[%s6553_s5 + $0x80] sm:$0xff]  ;;  %v1542_v32 = vld [vmem:[%s6553_s5 + $0xb0] sm:$0xff] }
  0x55   :  { %3499 = vmatprep.subr.bf16.mxu0 %v3498_v22  ;;  %v1538_v22 = vld [vmem:[%s6553_s5 + $0x90] sm:$0xff]  ;;  %v3560_v49 = vpack.c.bf16 %v1542_v32, %v1540_v30  ;;  %v1583_v30 = vld [vmem:[%s6553_s5 + $0x1f8] sm:$0xff] }
  0x56   :  { %v3556_v25 = vpack.c.bf16 %v1538_v22, %v1536_v21  ;;  %v1574_v16 = vld [vmem:[%s6553_s5 + $0x1b0] sm:$0xff]  ;;  %v1579_v21 = vld [vmem:[%s6553_s5 + $0x1d8] sm:$0xff] }
  0x57   :  { %2876 = vmatmul.mubr.msk.f32.gmra.mrb[2].mxu0 %vm139_vm1, %v4259_v56  ;;  %v3508_v56 = vpack.c.bf16 %v2925_v37, %v2920_v36  ;;  %v1544_v37 = vld [vmem:[%s6553_s5 + $0xc0] sm:$0xff]  ;;  %v3592_v17 = vpack.c.bf16 %v1574_v16, %v1572_v14 }
  0x58   :  { %3501 = vmatpush1.bf16.msra.mxu0 %v3500_v27  ;;  %517 = vmatprep.mubr.f32.mxu0 %v6558_v3  ;;  %v1541_v27 = vld [vmem:[%s6553_s5 + $0xa8] sm:$0xff] }
  0x59   :  { %3503 = vmatprep.subr.bf16.mxu0 %v3502_v28  ;;  %v1543_v28 = vld [vmem:[%s6553_s5 + $0xb8] sm:$0xff] }
  0x5a   :  { %v3558_v29 = vpack.c.bf16 %v1543_v28, %v1541_v27  ;;  %v1578_v27 = vld [vmem:[%s6553_s5 + $0x1d0] sm:$0xff] }
  0x5b   :  { %2877 = vmatmul.mubr.msk.f32.gmra.mrb[4].mxu0 %vm139_vm1, %v4292_v6  ;;  %v2930_v6 = vld [vmem:[%s6550_s1 + $0x410] sm:$0xff] }
  0x5c   :  { %3505 = vmatpush1.bf16.msra.mxu0 %v3504_v33  ;;  %523 = vmatprep.mubr.f32.mxu0 %v6558_v3  ;;  %v1545_v33 = vld [vmem:[%s6553_s5 + $0xc8] sm:$0xff] }
  0x5d   :  { %3507 = vmatprep.subr.bf16.mxu0 %v3506_v34  ;;  %v1547_v34 = vld [vmem:[%s6553_s5 + $0xd8] sm:$0xff] }
  0x5e   :  { %v3562_v36 = vpack.c.bf16 %v1547_v34, %v1545_v33  ;;  %v1582_v33 = vld [vmem:[%s6553_s5 + $0x1f0] sm:$0xff] }
  0x5f   :  { %2878 = vmatmul.mubr.msk.f32.gmra.mrb[6].mxu0 %vm139_vm1, %v4324_v19  ;;  %v3527_v19 = vpack.c.bf16 %v2899_v40, %v2894_v39  ;;  %v1551_v39 = vld [vmem:[%s6553_s5 + $0xf8] sm:$0xff] }
  0x60   :  { %3509 = vmatpush1.bf16.msra.mxu0 %v3508_v56  ;;  %529 = vmatprep.mubr.f32.mxu0 %v6558_v3  ;;  %v1546_v56 = vld [vmem:[%s6553_s5 + $0xd0] sm:$0xff] }
  0x61   :  { %806 = vmatprep.subr.mxu0 %v2931_v38  ;;  %v3564_v38 = vpack.c.bf16 %v1546_v56, %v1544_v37  ;;  %v1585_v37 = vld [vmem:[%s6553_s5 + $0x208] sm:$0xff]  ;;  %v1587_v56 = vld [vmem:[%s6553_s5 + $0x218] sm:$0xff] }
  0x63   :  { %2879 = vmatmul.mubr.msk.f32.gmra.mrb[8].mxu0 %vm139_vm1, %v4358_v31  ;;  %v3530_v31 = vpack.c.bf16 %v2909_v44, %v2904_v43  ;;  %v1550_v43 = vld [vmem:[%s6553_s5 + $0xf0] sm:$0xff] }
  0x64   :  { %807 = vmatpush1.msra.mxu0 %v2930_v6  ;;  %854 = vmatprep.mubr.f32.mxu0 %v6558_v3  ;;  %v1549_v6 = vld [vmem:[%s6553_s5 + $0xe8] sm:$0xff] }
  0x65   :  { %3526 = vmatprep.subr.bf16.mxu0 %v4098_v15  ;;  %v3566_v40 = vpack.c.bf16 %v1551_v39, %v1549_v6  ;;  %v3602_v6 = vpack.c.bf16 %v1587_v56, %v1585_v37 }
  0x67   :  { %2935 = vmatmul.mubr.msk.f32.vlgmr.msra.gmra.mrb[0].mxu0 %vm139_vm1, %v4551_v41 }
  0x68   :  { %3528 = vmatpush3.bf16.msra.mxu0 %v3527_v19  ;;  %860 = vmatprep.mubr.f32.mxu0 %v6558_v3  ;;  %v1548_v19 = vld [vmem:[%s6553_s5 + $0xe0] sm:$0xff] }
  0x69   :  { %3529 = vmatprep.subr.bf16.mxu0 %v4098_v15  ;;  %v3568_v44 = vpack.c.bf16 %v1550_v43, %v1548_v19 }
  0x6b   :  { %2936 = vmatmul.mubr.msk.f32.gmra.mrb[2].mxu0 %vm139_vm1, %v4579_v61 }
  0x6c   :  { %3531 = vmatpush3.bf16.msra.mxu0 %v3530_v31  ;;  %866 = vmatprep.mubr.f32.mxu0 %v6558_v3  ;;  %v1553_v31 = vld [vmem:[%s6553_s5 + $0x108] sm:$0xff] }
  0x6d   :  { %3532 = vmatprep.subr.bf16.mxu0 %v4098_v15  ;;  %v3570_v46 = vpack.c.bf16 %v1555_v45, %v1553_v31  ;;  %v1651_v31 = vld [vmem:[%s6553_s5 + $0x418] sm:$0xff] }
  0x6f   :  { %2937 = vmatmul.mubr.msk.f32.gmra.mrb[4].mxu0 %vm139_vm1, %v4609_v62 }
  0x70   :  { %3534 = vmatpush3.bf16.msra.mxu0 %v3533_v47  ;;  %872 = vmatprep.mubr.f32.mxu0 %v6558_v3  ;;  %v1552_v47 = vld [vmem:[%s6553_s5 + $0x100] sm:$0xff] }
  0x71   :  { %3535 = vmatprep.subr.bf16.mxu0 %v4098_v15  ;;  %v1521_v15 = vld [vmem:[%s6553_s5 + $0x8] sm:$0xff]  ;;  %v3572_v50 = vpack.c.bf16 %v1554_v48, %v1552_v47  ;;  %v1650_v47 = vld [vmem:[%s6553_s5 + $0x410] sm:$0xff] }
  0x73   :  { %2938 = vmatmul.mubr.msk.f32.gmra.mrb[6].mxu0 %vm139_vm1, %v4632_v23 }
  0x74   :  { %3537 = vmatpush3.bf16.msra.mxu0 %v3536_v51  ;;  %878 = vmatprep.mubr.f32.mxu0 %v6558_v3  ;;  %v1557_v51 = vld [vmem:[%s6553_s5 + $0x128] sm:$0xff] }
  0x75   :  { %3389 = vmatprep.subr.mxu0 %v6558_v3 }
  0x77   :  { %2939 = vmatmul.mubr.msk.f32.gmra.mrb[8].mxu0 %vm139_vm1, %v4651_v35 }
  0x78   :  { %3390 = vmatpush3.msra.mxu0 %v2934_v52  ;;  %3391 = vmatprep.mubr.msk.f32.mxu0 %vm4099_vm2, %v6558_v3  ;;  %v1559_v52 = vld [vmem:[%s6553_s5 + $0x138] sm:$0xff] }
  0x7b   :  { %3392 = vmatmul.mubr.msk.f32.vlgmr.msra.gmra.mrb[30].mxu0 %vm139_vm1, %v4551_v41  ;;  %v3538_v41 = vpack.c.bf16 %v1523_v53, %v1521_v15  ;;  %v3574_v15 = vpack.c.bf16 %v1559_v52, %v1557_v51  ;;  %v1556_v53 = vld [vmem:[%s6553_s5 + $0x120] sm:$0xff] }
  0x7c   :  { %3394 = vmatprep.mubr.msk.f32.mxu0 %vm4099_vm2, %v6558_v3 }
  0x7d   :  { %3539 = vmatprep.subr.bf16.mxu0 %v3538_v41  ;;  %v1558_v41 = vld [vmem:[%s6553_s5 + $0x130] sm:$0xff] }
  0x7f   :  { %3395 = vmatmul.mubr.msk.f32.gmra.mrb[32].mxu0 %vm139_vm1, %v4579_v61  ;;  %v1522_v61 = vld [vmem:[%s6553_s5 + $0x10] sm:$0xff] }
  0x80   :  { %3397 = vmatprep.mubr.msk.f32.mxu0 %vm4099_vm2, %v6558_v3  ;;  %v3540_v55 = vpack.c.bf16 %v1522_v61, %v1520_v54  ;;  %v3576_v54 = vpack.c.bf16 %v1558_v41, %v1556_v53  ;;  %v1561_v61 = vld [vmem:[%s6553_s5 + $0x148] sm:$0xff]  ;;  %v1655_v41 = vld [vmem:[%s6553_s5 + $0x438] sm:$0xff] }
  0x81   :  { %v1653_v53 = vld [vmem:[%s6553_s5 + $0x428] sm:$0xff] }
  0x82   :  { %3541 = vmatpush1.bf16.msra.mxu0 %v3540_v55  ;;  %v1563_v55 = vld [vmem:[%s6553_s5 + $0x158] sm:$0xff] }
  0x83   :  { %3398 = vmatmul.mubr.msk.f32.gmra.mrb[34].mxu0 %vm139_vm1, %v4609_v62  ;;  %v3544_v62 = vpack.c.bf16 %v1526_v10, %v1524_v60  ;;  %3543 = vmatprep.subr.bf16.mxu0 %v3542_v59  ;;  %v3578_v57 = vpack.c.bf16 %v1563_v55, %v1561_v61  ;;  %v1562_v59 = vld [vmem:[%s6553_s5 + $0x150] sm:$0xff]  ;;  %v1565_v60 = vld [vmem:[%s6553_s5 + $0x168] sm:$0xff]  ;;  %v1652_v61 = vld [vmem:[%s6553_s5 + $0x420] sm:$0xff] }
  0x84   :  { %3400 = vmatprep.mubr.msk.f32.mxu0 %vm4099_vm2, %v6558_v3  ;;  %v3580_v10 = vpack.c.bf16 %v1562_v59, %v1560_v58  ;;  %v1654_v55 = vld [vmem:[%s6553_s5 + $0x430] sm:$0xff]  ;;  %v1659_v58 = vld [vmem:[%s6553_s5 + $0x458] sm:$0xff] }
  0x86   :  { %3545 = vmatpush1.bf16.msra.mxu0 %v3544_v62  ;;  %v1567_v62 = vld [vmem:[%s6553_s5 + $0x178] sm:$0xff] }
  0x87   :  { %3401 = vmatmul.mubr.msk.f32.gmra.mrb[36].mxu0 %vm139_vm1, %v4632_v23  ;;  %3547 = vmatprep.subr.bf16.mxu0 %v3546_v1  ;;  %v1535_v23 = vld [vmem:[%s6553_s5 + $0x78] sm:$0xff]  ;;  %v3582_v1 = vpack.c.bf16 %v1567_v62, %v1565_v60  ;;  %v1656_v60 = vld [vmem:[%s6553_s5 + $0x440] sm:$0xff] }
  0x88   :  { %3403 = vmatprep.mubr.msk.f32.mxu0 %vm4099_vm2, %v6558_v3  ;;  %v3550_v9 = vpack.c.bf16 %v1535_v23, %v1533_v7  ;;  %v3586_v7 = vpack.c.bf16 %v1571_v4, %v1569_v2  ;;  %v1568_v23 = vld [vmem:[%s6553_s5 + $0x180] sm:$0xff]  ;;  %v1662_v2 = vld [vmem:[%s6553_s5 + $0x470] sm:$0xff] }
  0x89   :  { %v1596_v3 = vld [vmem:[%s6553_s5 + $0x260] sm:$0xff] }
  0x8a   :  { %3549 = vmatpush1.bf16.msra.mxu0 %v3548_v5  ;;  %v3584_v5 = vpack.c.bf16 %v1566_v0, %v1564_v63  ;;  %v1661_v63 = vld [vmem:[%s6553_s5 + $0x468] sm:$0xff]  ;;  %v1663_v0 = vld [vmem:[%s6553_s5 + $0x478] sm:$0xff] }
  0x8b   :  { %3404 = vmatmul.mubr.msk.f32.gmra.mrb[38].mxu0 %vm139_vm1, %v4651_v35  ;;  %v3552_v35 = vpack.c.bf16 %v1534_v12, %v1532_v11  ;;  %3551 = vmatprep.subr.bf16.mxu0 %v3550_v9  ;;  %v1573_v9 = vld [vmem:[%s6553_s5 + $0x1a8] sm:$0xff]  ;;  %v1575_v11 = vld [vmem:[%s6553_s5 + $0x1b8] sm:$0xff]  ;;  %v3588_v12 = vpack.c.bf16 %v1570_v8, %v1568_v23  ;;  %v3678_v4 = vpack.c.bf16 %v1663_v0, %v1661_v63 }
  0x8c   :  { %v3017_v23 = vld [vmem:[%s6553_s5 + $0x698] sm:$0xff] }
  0x8e   :  { %3553 = vmatpush1.bf16.msra.mxu0 %v3552_v35  ;;  %v3590_v35 = vpack.c.bf16 %v1575_v11, %v1573_v9 }
  0x8f   :  { %3555 = vmatprep.subr.bf16.mxu0 %v3554_v20  ;;  %v1577_v20 = vld [vmem:[%s6553_s5 + $0x1c8] sm:$0xff] }
  0x90   :  { %v3594_v22 = vpack.c.bf16 %v1579_v21, %v1577_v20 }
  0x92   :  { %3557 = vmatpush1.bf16.msra.mxu0 %v3556_v25  ;;  %v1576_v25 = vld [vmem:[%s6553_s5 + $0x1c0] sm:$0xff] }
  0x93   :  { %3559 = vmatprep.subr.bf16.mxu0 %v3558_v29  ;;  %v3596_v28 = vpack.c.bf16 %v1578_v27, %v1576_v25  ;;  %v1581_v29 = vld [vmem:[%s6553_s5 + $0x1e8] sm:$0xff] }
  0x94   :  { %v3598_v32 = vpack.c.bf16 %v1583_v30, %v1581_v29 }
  0x96   :  { %3561 = vmatpush1.bf16.msra.mxu0 %v3560_v49  ;;  %v1580_v49 = vld [vmem:[%s6553_s5 + $0x1e0] sm:$0xff] }
  0x97   :  { %3563 = vmatprep.subr.bf16.mxu0 %v3562_v36  ;;  %v3600_v34 = vpack.c.bf16 %v1582_v33, %v1580_v49 }
  0x9a   :  { %3565 = vmatpush1.bf16.msra.mxu0 %v3564_v38 }
  0x9b   :  { %3567 = vmatprep.subr.bf16.mxu0 %v3566_v40 }
  0x9e   :  { %3569 = vmatpush1.bf16.msra.mxu0 %v3568_v44  ;;  %v1649_v44 = vld [vmem:[%s6553_s5 + $0x408] sm:$0xff] }
  0x9f   :  { %3571 = vmatprep.subr.bf16.mxu0 %v3570_v46  ;;  %v3666_v45 = vpack.c.bf16 %v1651_v31, %v1649_v44  ;;  %v1648_v46 = vld [vmem:[%s6553_s5 + $0x400] sm:$0xff] }
  0xa1   :  { %3667 = vmatprep.subr.bf16.mxu1 %v3666_v45 }
  0xa2   :  { %3573 = vmatpush1.bf16.msra.mxu0 %v3572_v50  ;;  %v3668_v50 = vpack.c.bf16 %v1650_v47, %v1648_v46 }
  0xa3   :  { %3575 = vmatprep.subr.bf16.mxu0 %v3574_v15 }
  0xa4   :  { %3669 = vmatpush1.bf16.msra.mxu1 %v3668_v50 }
  0xa6   :  { %3577 = vmatpush1.bf16.msra.mxu0 %v3576_v54  ;;  %v3670_v54 = vpack.c.bf16 %v1655_v41, %v1653_v53 }
  0xa7   :  { %3579 = vmatprep.subr.bf16.mxu0 %v3578_v57  ;;  %v1657_v57 = vld [vmem:[%s6553_s5 + $0x448] sm:$0xff] }
  0xa8   :  { %3671 = vmatprep.subr.bf16.mxu1 %v3670_v54  ;;  %v3674_v59 = vpack.c.bf16 %v1659_v58, %v1657_v57 }
  0xaa   :  { %3581 = vmatpush1.bf16.msra.mxu0 %v3580_v10  ;;  %v1658_v10 = vld [vmem:[%s6553_s5 + $0x450] sm:$0xff] }
  0xab   :  { %3583 = vmatprep.subr.bf16.mxu0 %v3582_v1  ;;  %v3676_v62 = vpack.c.bf16 %v1658_v10, %v1656_v60  ;;  %v1660_v1 = vld [vmem:[%s6553_s5 + $0x460] sm:$0xff] }
  0xae   :  { %3585 = vmatpush1.bf16.msra.mxu0 %v3584_v5  ;;  %v3680_v5 = vpack.c.bf16 %v1662_v2, %v1660_v1 }
  0xaf   :  { %3587 = vmatprep.subr.bf16.mxu0 %v3586_v7  ;;  %v3015_v7 = vld [vmem:[%s6553_s5 + $0x688] sm:$0xff] }
  0xb0   :  { %v3746_v8 = vpack.c.bf16 %v3017_v23, %v3015_v7 }
  0xb2   :  { %3589 = vmatpush1.bf16.msra.mxu0 %v3588_v12 }
  0xb3   :  { %3591 = vmatprep.subr.bf16.mxu0 %v3590_v35 }
  0xb6   :  { %3593 = vmatpush1.bf16.msra.mxu0 %v3592_v17 }
  0xb7   :  { %3595 = vmatprep.subr.bf16.mxu0 %v3594_v22 }
  0xba   :  { %3597 = vmatpush1.bf16.msra.mxu0 %v3596_v28 }
  0xbb   :  { %3599 = vmatprep.subr.bf16.mxu0 %v3598_v32 }
  0xbe   :  { %3601 = vmatpush1.bf16.msra.mxu0 %v3600_v34 }
  0xbf   :  { %3603 = vmatprep.subr.bf16.mxu0 %v3602_v6 }
  0xc1   :  { %v5002_v36 = vpop.permute.xlu0 %1180 }
  0xc2   :  { %v5012_v38 = vmul.f32 %v4868_v26, %v5002_v36  ;;  %v5014_v39 = vpop.permute.xlu1 %1190 }
  0xc3   :  { %v5020_v19 = vmul.f32 %v4868_v26, %v5014_v39 }
  0xc5   :  { %v5016_v40 = vpop.permute.xlu0 %1185 }
  0xc6   :  { %v5024_v43 = vmul.f32 %v4868_v26, %v5016_v40  ;;  %v5038_v48 = vpop.permute.xlu1 %1195 }
  0xc7   :  { %v5042_v51 = vmul.f32 %v4868_v26, %v5038_v48 }
  0xc9   :  { %v5044_v52 = vpop.permute.xlu0 %1200 }
  0xca   :  { %v5048_v15 = vmul.f32 %v4868_v26, %v5044_v52  ;;  %v3672_v26 = vpack.c.bf16 %v1654_v55, %v1652_v61 }
  0xcc   :  { %3673 = vmatpush1.bf16.msra.mxu1 %v3672_v26 }
  0xcd   :  { %3675 = vmatprep.subr.bf16.mxu1 %v3674_v59 }
  0xd0   :  { %3677 = vmatpush1.bf16.msra.mxu1 %v3676_v62 }
  0xd1   :  { %3679 = vmatprep.subr.bf16.mxu1 %v3678_v4 }
  0xd4   :  { %3681 = vmatpush1.bf16.msra.mxu1 %v3680_v5 }
  0xd5   :  { %3747 = vmatprep.subr.bf16.mxu1 %v3746_v8 }
  0xfe   :  { %v312_v9 = vpop.f32.mrb[10].mxu0 }
  0xff   :  { %v314_v11 = vpop.f32.mrb[11].mxu0  ;;  %v697_v12 = vpop.f32.mrb[10].mxu1 }
 0x100   :  { %v3360_v35 = vpop.f32.mrb[11].mxu1 }
 0x102   :  { %v318_v14 = vpop.f32.mrb[12].mxu0 }
 0x103   :  { %v320_v16 = vpop.f32.mrb[13].mxu0  ;;  %v702_v17 = vpop.f32.mrb[12].mxu1 }
 0x104   :  { %v3363_v20 = vpop.f32.mrb[13].mxu1 }
 0x106   :  { %v324_v21 = vpop.f32.mrb[14].mxu0 }
 0x107   :  { %v326_v22 = vpop.f32.mrb[15].mxu0  ;;  %v707_v25 = vpop.f32.mrb[14].mxu1 }
 0x108   :  { %v3366_v27 = vpop.f32.mrb[15].mxu1 }
 0x10a   :  { %v330_v28 = vpop.f32.mrb[16].mxu0 }
 0x10b   :  { %v332_v29 = vpop.f32.mrb[17].mxu0  ;;  %v712_v30 = vpop.f32.mrb[16].mxu1 }
 0x10c   :  { %v3369_v32 = vpop.f32.mrb[17].mxu1 }
 0x10e   :  { %v336_v49 = vpop.f32.mrb[18].mxu0 }
 0x10f   :  { %v338_v33 = vpop.f32.mrb[19].mxu0  ;;  %v717_v34 = vpop.f32.mrb[18].mxu1 }
 0x110   :  { %v3372_v37 = vpop.f32.mrb[19].mxu1 }
 0x112   :  { %v407_v56 = vpop.f32.mrb[20].mxu0 }
 0x113   :  { %v5092_v6 = vadd.f32 %v697_v12, %v407_v56  ;;  %v951_v44 = vpop.f32.mrb[0].mxu1  ;;  %v3327_v31 = vpop.f32.mrb[21].mxu0 }
 0x114   :  { %v3970_v45 = vadd.f32 %v951_v44, %v312_v9  ;;  %v953_v46 = vpop.f32.mrb[1].mxu1  ;;  %v5133_v44 = vsub.s32 0, %v4839_v13 }
 0x115   :  { %v5094_v47 = vadd.f32 %v953_v46, %v314_v11 }
 0x116   :  { %v1124_v50 = vadd.f32 %v3970_v45, %v4860_v24  ;;  %v412_v53 = vpop.f32.mrb[22].mxu0 }
 0x117   :  { %v5097_v41 = vadd.f32 %v702_v17, %v412_v53  ;;  %v957_v54 = vpop.f32.mrb[2].mxu1  ;;  %v3330_v61 = vpop.f32.mrb[23].mxu0 }
 0x118   :  { %v1149_v55 = vmax.f32 %v1124_v50, 0.0  ;;  %v3972_v26 = vadd.f32 %v957_v54, %v318_v14  ;;  %v959_v57 = vpop.f32.mrb[3].mxu1 }
 0x119   :  { %v5099_v58 = vadd.f32 %v959_v57, %v320_v16 }
 0x11a   :  { %v5102_v59 = vmul.f32 %v5012_v38, %v1149_v55  ;;  %v1129_v60 = vadd.f32 %v3972_v26, %v4860_v24  ;;  %v417_v10 = vpop.f32.mrb[24].mxu0  ;;  %v1111_v26 = vsub.s32 3, %v4839_v13 }
 0x11b   :  { %v5105_v62 = vadd.f32 %v707_v25, %v417_v10  ;;  %v963_v63 = vpop.f32.mrb[4].mxu1  ;;  %v3333_v0 = vpop.f32.mrb[25].mxu0 }
 0x11c   :  { %v1154_v1 = vmax.f32 %v1129_v60, 0.0  ;;  %v3974_v2 = vadd.f32 %v963_v63, %v324_v21  ;;  %v965_v4 = vpop.f32.mrb[5].mxu1  ;;  %v1584_v0 = vld [vmem:[%s6553_s5 + $0x200] sm:$0xff] }
 0x11d   :  { %v5107_v5 = vadd.f32 %v965_v4, %v326_v22 }
 0x11e   :  { %v5110_v7 = vmul.f32 %v5024_v43, %v1154_v1  ;;  %v1134_v23 = vadd.f32 %v3974_v2, %v4860_v24  ;;  %v422_v8 = vpop.f32.mrb[26].mxu0  ;;  %v1586_v1 = vld [vmem:[%s6553_s5 + $0x210] sm:$0xff] }
 0x11f   :  { %v5113_v38 = vadd.f32 %v712_v30, %v422_v8  ;;  %v969_v9 = vpop.f32.mrb[6].mxu1  ;;  %v3336_v11 = vpop.f32.mrb[27].mxu0  ;;  %v1589_v8 = vld [vmem:[%s6553_s5 + $0x228] sm:$0xff] }
 0x120   :  { %v1159_v12 = vmax.f32 %v1134_v23, 0.0  ;;  %v3976_v35 = vadd.f32 %v969_v9, %v330_v28  ;;  %v971_v14 = vpop.f32.mrb[7].mxu1  ;;  %v1591_v9 = vld [vmem:[%s6553_s5 + $0x238] sm:$0xff]  ;;  %v5184_v11 = vrot.slane %v4865_v42, %v1111_v26 }
 0x121   :  { %v5115_v16 = vadd.f32 %v971_v14, %v332_v29 }
 0x122   :  { %v5118_v17 = vmul.f32 %v5020_v19, %v1159_v12  ;;  %v1139_v20 = vadd.f32 %v3976_v35, %v4860_v24  ;;  %v427_v21 = vpop.f32.mrb[28].mxu0  ;;  %v1115_v12 = vsub.s32 4, %v4839_v13 }
 0x123   :  { %v5121_v43 = vadd.f32 %v717_v34, %v427_v21  ;;  %v975_v22 = vpop.f32.mrb[8].mxu1  ;;  %v3339_v25 = vpop.f32.mrb[29].mxu0  ;;  %v5136_v34 = vsub.s32 1, %v4839_v13  ;;  %v1602_v13 = vld [vmem:[%s6553_s5 + $0x290] sm:$0xff] }
 0x124   :  { %v1164_v27 = vmax.f32 %v1139_v20, 0.0  ;;  %v3978_v30 = vadd.f32 %v975_v22, %v336_v49  ;;  %v977_v32 = vpop.f32.mrb[9].mxu1  ;;  %v5140_v49 = vrot.slane %v4851_v18, %v5133_v44 }
 0x125   :  { %v5123_v37 = vadd.f32 %v977_v32, %v338_v33 }
 0x126   :  { %v5126_v28 = vmul.f32 %v5042_v51, %v1164_v27  ;;  %v1144_v29 = vadd.f32 %v3978_v30, %v4860_v24  ;;  %v5144_v51 = vrot.slane %v4865_v42, %v5133_v44  ;;  %v5148_v24 = vrot.slane %v4851_v18, %v5136_v34 }
 0x127   :  { %v3604_v27 = vpack.c.bf16 %v1586_v1, %v1584_v0 }
 0x128   :  { %v1169_v56 = vmax.f32 %v1144_v29, 0.0  ;;  %v1229_v45 = vmul.f32 %v5144_v51, %v5002_v36  ;;  %v1234_v10 = vmul.f32 %v5144_v51, %v5016_v40  ;;  %v1239_v22 = vmul.f32 %v5144_v51, %v5014_v39 }
 0x12a   :  { %v5130_v19 = vmul.f32 %v5048_v15, %v1169_v56  ;;  %v5152_v15 = vrot.slane %v4865_v42, %v5136_v34 }
 0x12c   :  { %v1230_v53 = vmul.f32 %v5152_v15, %v5002_v36  ;;  %v1235_v23 = vmul.f32 %v5152_v15, %v5016_v40 }
 0x13a   :  { %v856_v33 = vpop.f32.mrb[0].mxu0 }
 0x13b   :  { %v1122_v31 = vadd.f32 %v5140_v49, %v856_v33  ;;  %v858_v46 = vpop.f32.mrb[1].mxu0  ;;  %v3606_v33 = vpack.c.bf16 %v1591_v9, %v1589_v8  ;;  %v1592_v8 = vld [vmem:[%s6553_s5 + $0x240] sm:$0xff] }
 0x13c   :  { %v1123_v50 = vadd.f32 %v5148_v24, %v858_v46 }
 0x13d   :  { %v1147_v54 = vmax.f32 %v1122_v31, 0.0  ;;  %v1588_v31 = vld [vmem:[%s6553_s5 + $0x220] sm:$0xff] }
 0x13e   :  { %v1148_v61 = vmax.f32 %v1123_v50, 0.0  ;;  %v862_v55 = vpop.f32.mrb[2].mxu0 }
 0x13f   :  { %v5161_v57 = vmul.f32 %v1229_v45, %v1147_v54  ;;  %v1127_v60 = vadd.f32 %v5140_v49, %v862_v55  ;;  %v864_v63 = vpop.f32.mrb[3].mxu0  ;;  %v1590_v45 = vld [vmem:[%s6553_s5 + $0x230] sm:$0xff]  ;;  %v1593_v54 = vld [vmem:[%s6553_s5 + $0x248] sm:$0xff]  ;;  %v5219_v55 = vrot.slane %v4851_v18, %v1111_v26 }
 0x140   :  { %v5172_v2 = vmul.f32 %v1230_v53, %v1148_v61  ;;  %v1128_v4 = vadd.f32 %v5148_v24, %v864_v63  ;;  %v1240_v53 = vmul.f32 %v5152_v15, %v5014_v39  ;;  %v1595_v61 = vld [vmem:[%s6553_s5 + $0x258] sm:$0xff]  ;;  %v3608_v26 = vpack.c.bf16 %v1590_v45, %v1588_v31 }
 0x141   :  { %v1152_v35 = vmax.f32 %v1127_v60, 0.0  ;;  %v1449_v30 = vrot.slane %v5161_v57, 7  ;;  %v5223_v60 = vmul.f32 %v5184_v11, %v5002_v36  ;;  %v1245_v31 = vmul.f32 %v5152_v15, %v5038_v48 }
 0x142   :  { %v1153_v20 = vmax.f32 %v1128_v4, 0.0  ;;  %v868_v21 = vpop.f32.mrb[4].mxu0  ;;  %v1450_v25 = vrot.slane %v5172_v2, 7 }
 0x143   :  { %v5196_v32 = vmul.f32 %v1234_v10, %v1152_v35  ;;  %v1132_v29 = vadd.f32 %v5140_v49, %v868_v21  ;;  %v870_v56 = vpop.f32.mrb[5].mxu0  ;;  %v5228_v10 = vrot.slane %v4865_v42, %v1115_v12  ;;  %v1594_v42 = vld [vmem:[%s6553_s5 + $0x250] sm:$0xff] }
 0x144   :  { %v5205_v46 = vmul.f32 %v1235_v23, %v1153_v20  ;;  %v1133_v50 = vadd.f32 %v5148_v24, %v870_v56  ;;  %3095 = vmatprep.mubr.msk.f32.mxu0 %vm5188_vm4, %v1450_v25  ;;  %v1244_v20 = vmul.f32 %v5144_v51, %v5038_v48 }
 0x145   :  { %v1157_v63 = vmax.f32 %v1132_v29, 0.0  ;;  %3097 = vmatmul.mubr.msk.f32.vlgmr.msra.gmra.mrb[40].mxu0 %vm5188_vm4, %v1449_v30  ;;  %v1454_v23 = vrot.slane %v5196_v32, 7 }
 0x146   :  { %v1158_v0 = vmax.f32 %v1133_v50, 0.0  ;;  %3605 = vmatpush1.bf16.msra.mxu0 %v3604_v27  ;;  %v874_v1 = vpop.f32.mrb[6].mxu0  ;;  %v1456_v4 = vrot.slane %v5205_v46, 7  ;;  %v3610_v27 = vpack.c.bf16 %v1595_v61, %v1593_v54  ;;  %v1599_v50 = vld [vmem:[%s6553_s5 + $0x278] sm:$0xff]  ;;  %v1249_v54 = vmul.f32 %v5144_v51, %v5044_v52 }
 0x147   :  { %v5240_v9 = vmul.f32 %v1239_v22, %v1157_v63  ;;  %v1137_v35 = vadd.f32 %v5140_v49, %v874_v1  ;;  %v876_v21 = vpop.f32.mrb[7].mxu0  ;;  %3607 = vmatprep.subr.bf16.mxu0 %v3606_v33  ;;  %v1597_v22 = vld [vmem:[%s6553_s5 + $0x268] sm:$0xff]  ;;  %v1125_v33 = vadd.f32 %v5094_v47, %v5219_v55  ;;  %v3612_v61 = vpack.c.bf16 %v1594_v42, %v1592_v8  ;;  %v1598_v47 = vld [vmem:[%s6553_s5 + $0x270] sm:$0xff] }
 0x148   :  { %v5245_v29 = vmul.f32 %v1240_v53, %v1158_v0  ;;  %v1138_v56 = vadd.f32 %v5148_v24, %v876_v21  ;;  %v1457_v45 = vsel %vm82_vm0, %v1450_v25, %v1456_v4  ;;  %v1455_v0 = vsel %vm82_vm0, %v1449_v30, %v1454_v23 }
 0x149   :  { %v1162_v53 = vmax.f32 %v1137_v35, 0.0  ;;  %1746 = vmatprep.mubr.f32.mxu0 %v1457_v45  ;;  %v1464_v21 = vrot.slane %v5240_v9, 7  ;;  %v3614_v30 = vpack.c.bf16 %v1599_v50, %v1597_v22 }
 0x14a   :  { %v1163_v63 = vmax.f32 %v1138_v56, 0.0  ;;  %3609 = vmatpush1.bf16.msra.mxu0 %v3608_v26  ;;  %v880_v25 = vpop.f32.mrb[8].mxu0  ;;  %v1466_v1 = vrot.slane %v5245_v29, 7  ;;  %v1250_v56 = vmul.f32 %v5152_v15, %v5044_v52 }
 0x14b   :  { %v5270_v35 = vmul.f32 %v1244_v20, %v1162_v53  ;;  %v1142_v51 = vadd.f32 %v5140_v49, %v880_v25  ;;  %1747 = vmatmul.mubr.f32.gmra.mrb[42].mxu0 %v1455_v0  ;;  %v882_v26 = vpop.f32.mrb[9].mxu0  ;;  %3611 = vmatprep.subr.bf16.mxu0 %v3610_v27  ;;  %v1601_v20 = vld [vmem:[%s6553_s5 + $0x288] sm:$0xff]  ;;  %v1603_v49 = vld [vmem:[%s6553_s5 + $0x298] sm:$0xff]  ;;  %v1150_v53 = vmax.f32 %v1125_v33, 0.0  ;;  %v1465_v22 = vsel %vm82_vm0, %v1454_v23, %v1464_v21  ;;  %v1600_v33 = vld [vmem:[%s6553_s5 + $0x280] sm:$0xff] }
 0x14c   :  { %v5273_v8 = vmul.f32 %v1245_v31, %v1163_v63  ;;  %v1143_v42 = vadd.f32 %v5148_v24, %v882_v26  ;;  %v1467_v45 = vsel %vm82_vm0, %v1456_v4, %v1466_v1  ;;  %v5288_v24 = vrot.slane %v4851_v18, %v1115_v12  ;;  %v1605_v0 = vld [vmem:[%s6553_s5 + $0x2a8] sm:$0xff] }
 0x14d   :  { %v1167_v27 = vmax.f32 %v1142_v51, 0.0  ;;  %1752 = vmatprep.mubr.f32.mxu0 %v1467_v45  ;;  %v3616_v31 = vpack.c.bf16 %v1598_v47, %v1596_v3  ;;  %v1474_v63 = vrot.slane %v5270_v35, 7  ;;  %v3618_v23 = vpack.c.bf16 %v1603_v49, %v1601_v20  ;;  %v1607_v47 = vld [vmem:[%s6553_s5 + $0x2b8] sm:$0xff]  ;;  %v1604_v45 = vld [vmem:[%s6553_s5 + $0x2a0] sm:$0xff] }
 0x14e   :  { %v1168_v15 = vmax.f32 %v1143_v42, 0.0  ;;  %3613 = vmatpush1.bf16.msra.mxu0 %v3612_v61  ;;  %v1046_v4 = vpop.f32.mrb[30].mxu0  ;;  %v1476_v50 = vrot.slane %v5273_v8, 7  ;;  %v3620_v51 = vpack.c.bf16 %v1602_v13, %v1600_v33  ;;  %v5315_v26 = vmul.f32 %v5223_v60, %v1150_v53 }
 0x14f   :  { %v5299_v18 = vmul.f32 %v1249_v54, %v1167_v27  ;;  %v1074_v3 = vadd.f32 %v1046_v4, %v5092_v6  ;;  %1753 = vmatmul.mubr.f32.gmra.mrb[44].mxu0 %v1465_v22  ;;  %v3393_v12 = vpop.f32.mrb[31].mxu0  ;;  %3615 = vmatprep.subr.bf16.mxu0 %v3614_v30  ;;  %v1233_v6 = vmul.f32 %v5228_v10, %v5002_v36  ;;  %v1606_v36 = vld [vmem:[%s6553_s5 + $0x2b0] sm:$0xff] }
 0x150   :  { %v5302_v61 = vmul.f32 %v1250_v56, %v1168_v15  ;;  %v1477_v25 = vsel %vm82_vm0, %v1466_v1, %v1476_v50  ;;  %v1475_v30 = vsel %vm82_vm0, %v1464_v21, %v1474_v63  ;;  %v3622_v53 = vpack.c.bf16 %v1607_v47, %v1605_v0  ;;  %v3014_v21 = vld [vmem:[%s6553_s5 + $0x680] sm:$0xff]  ;;  %v3016_v27 = vld [vmem:[%s6553_s5 + $0x690] sm:$0xff]  ;;  %v1609_v15 = vld [vmem:[%s6553_s5 + $0x2c8] sm:$0xff] }
 0x151   :  { %v1126_v54 = vadd.f32 %v5288_v24, %v1074_v3  ;;  %1758 = vmatprep.mubr.f32.mxu0 %v1477_v25  ;;  %v1484_v56 = vrot.slane %v5299_v18, 7  ;;  %v1238_v33 = vmul.f32 %v5228_v10, %v5016_v40  ;;  %v3624_v13 = vpack.c.bf16 %v1606_v36, %v1604_v45  ;;  %v3021_v3 = vld [vmem:[%s6553_s5 + $0x6b8] sm:$0xff]  ;;  %v1608_v47 = vld [vmem:[%s6553_s5 + $0x2c0] sm:$0xff]  ;;  %v1613_v45 = vld [vmem:[%s6553_s5 + $0x2e8] sm:$0xff] }
 0x152   :  { %3617 = vmatpush1.bf16.msra.mxu0 %v3616_v31  ;;  %v1051_v1 = vpop.f32.mrb[32].mxu0  ;;  %v1486_v42 = vrot.slane %v5302_v61, 7  ;;  %v1452_v25 = vrot.slane %v5315_v26, 7  ;;  %v3748_v0 = vpack.c.bf16 %v3016_v27, %v3014_v21  ;;  %v1615_v36 = vld [vmem:[%s6553_s5 + $0x2f8] sm:$0xff]  ;;  %v3023_v21 = vld [vmem:[%s6553_s5 + $0x6c8] sm:$0xff] }
 0x153   :  { %v1151_v20 = vmax.f32 %v1126_v54, 0.0  ;;  %v1079_v60 = vadd.f32 %v1051_v1, %v5097_v41  ;;  %1759 = vmatmul.mubr.f32.gmra.mrb[46].mxu0 %v1475_v30  ;;  %3619 = vmatprep.subr.bf16.mxu0 %v3618_v23  ;;  %v3396_v49 = vpop.f32.mrb[33].mxu0  ;;  %v1611_v41 = vld [vmem:[%s6553_s5 + $0x2d8] sm:$0xff]  ;;  %v1485_v23 = vsel %vm82_vm0, %v1474_v63, %v1484_v56  ;;  %v1610_v63 = vld [vmem:[%s6553_s5 + $0x2d0] sm:$0xff] }
 0x154   :  { %v1487_v31 = vsel %vm82_vm0, %v1476_v50, %v1486_v42  ;;  %v3019_v50 = vld [vmem:[%s6553_s5 + $0x6a8] sm:$0xff]  ;;  %v3018_v42 = vld [vmem:[%s6553_s5 + $0x6a0] sm:$0xff]  ;;  %v3020_v56 = vld [vmem:[%s6553_s5 + $0x6b0] sm:$0xff]  ;;  %v1243_v49 = vmul.f32 %v5228_v10, %v5014_v39 }
 0x155   :  { %v5340_v4 = vmul.f32 %v1233_v6, %v1151_v20  ;;  %v1131_v22 = vadd.f32 %v5288_v24, %v1079_v60  ;;  %1764 = vmatprep.mubr.f32.mxu0 %v1487_v31  ;;  %v3025_v27 = vld [vmem:[%s6553_s5 + $0x6d8] sm:$0xff] }
 0x156   :  { %3621 = vmatpush1.bf16.msra.mxu0 %v3620_v51  ;;  %v1056_v12 = vpop.f32.mrb[34].mxu0  ;;  %v3626_v51 = vpack.c.bf16 %v1611_v41, %v1609_v15  ;;  %v3628_v15 = vpack.c.bf16 %v1610_v63, %v1608_v47  ;;  %v3752_v41 = vpack.c.bf16 %v3020_v56, %v3018_v42  ;;  %v3022_v47 = vld [vmem:[%s6553_s5 + $0x6c0] sm:$0xff] }
 0x157   :  { %v1453_v54 = vrot.slane %v5340_v4, 7  ;;  %v1156_v6 = vmax.f32 %v1131_v22, 0.0  ;;  %v1084_v1 = vadd.f32 %v1056_v12, %v5105_v62  ;;  %1765 = vmatmul.mubr.f32.gmra.mrb[48].mxu0 %v1485_v23  ;;  %3623 = vmatprep.subr.bf16.mxu0 %v3622_v53  ;;  %v3399_v30 = vpop.f32.mrb[35].mxu0  ;;  %v3750_v62 = vpack.c.bf16 %v3021_v3, %v3019_v50  ;;  %v1612_v22 = vld [vmem:[%s6553_s5 + $0x2e0] sm:$0xff] }
 0x158   :  { %3099 = vmatprep.mubr.msk.f32.mxu0 %vm5188_vm4, %v1452_v25  ;;  %v3630_v23 = vpack.c.bf16 %v1615_v36, %v1613_v45  ;;  %v1619_v30 = vld [vmem:[%s6553_s5 + $0x318] sm:$0xff] }
 0x159   :  { %v5377_v20 = vmul.f32 %v1238_v33, %v1156_v6  ;;  %v1136_v60 = vadd.f32 %v5288_v24, %v1084_v1  ;;  %v1519_v53 = vsel %vm82_vm0, 0.0, %v1453_v54  ;;  %v3024_v6 = vld [vmem:[%s6553_s5 + $0x6d0] sm:$0xff]  ;;  %v6562_v1 = vmov 0.0   ;;  %v3029_v45 = vld [vmem:[%s6553_s5 + $0x6f8] sm:$0xff] }
 0x15a   :  { %3625 = vmatpush1.bf16.msra.mxu0 %v3624_v13  ;;  %v1061_v31 = vpop.f32.mrb[36].mxu0  ;;  %3102 = vmatmul.mubr.msk.f32.vlgmr.msra.gmra.mrb[20].mxu1 %vm1664_vm5, %v1519_v53  ;;  %v1614_v13 = vld [vmem:[%s6553_s5 + $0x2f0] sm:$0xff]  ;;  %v3756_v53 = vpack.c.bf16 %v3024_v6, %v3022_v47  ;;  %v3031_v6 = vld [vmem:[%s6553_s5 + $0x708] sm:$0xff] }
 0x15b   :  { %v1161_v33 = vmax.f32 %v1136_v60, 0.0  ;;  %v1089_v50 = vadd.f32 %v1061_v31, %v5113_v38  ;;  %3749 = vmatpush1.bf16.msra.mxu1 %v3748_v0  ;;  %3627 = vmatprep.subr.bf16.mxu0 %v3626_v51  ;;  %v3402_v3 = vpop.f32.mrb[37].mxu0  ;;  %v1462_v12 = vrot.slane %v5377_v20, 7  ;;  %v3754_v38 = vpack.c.bf16 %v3025_v27, %v3023_v21  ;;  %v1617_v0 = vld [vmem:[%s6553_s5 + $0x308] sm:$0xff]  ;;  %v1616_v31 = vld [vmem:[%s6553_s5 + $0x300] sm:$0xff] }
 0x15c   :  { %1936 = vmatprep.mubr.f32.mxu1 %v6562_v1  ;;  %3751 = vmatprep.subr.bf16.mxu1 %v3750_v62  ;;  %v1248_v51 = vmul.f32 %v5228_v10, %v5038_v48  ;;  %v3027_v62 = vld [vmem:[%s6553_s5 + $0x6e8] sm:$0xff]  ;;  %v3632_v60 = vpack.c.bf16 %v1614_v13, %v1612_v22  ;;  %v3634_v27 = vpack.c.bf16 %v1619_v30, %v1617_v0  ;;  %v3026_v22 = vld [vmem:[%s6553_s5 + $0x6e0] sm:$0xff]  ;;  %v1623_v3 = vld [vmem:[%s6553_s5 + $0x338] sm:$0xff] }
 0x15d   :  { %v5413_v63 = vmul.f32 %v1243_v49, %v1161_v33  ;;  %v1141_v42 = vadd.f32 %v5288_v24, %v1089_v50  ;;  %v1463_v56 = vsel %vm82_vm0, %v1453_v54, %v1462_v12  ;;  %v1621_v50 = vld [vmem:[%s6553_s5 + $0x328] sm:$0xff]  ;;  %v1253_v0 = vmul.f32 %v5228_v10, %v5044_v52 }
 0x15e   :  { %3629 = vmatpush1.bf16.msra.mxu0 %v3628_v15  ;;  %v1066_v36 = vpop.f32.mrb[38].mxu0  ;;  %3103 = vmatmul.mubr.msk.f32.gmra.mrb[22].mxu1 %vm1664_vm5, %v1463_v56  ;;  %v1618_v15 = vld [vmem:[%s6553_s5 + $0x310] sm:$0xff]  ;;  %v1620_v56 = vld [vmem:[%s6553_s5 + $0x320] sm:$0xff] }
 0x15f   :  { %v1166_v49 = vmax.f32 %v1141_v42, 0.0  ;;  %v1094_v21 = vadd.f32 %v1066_v36, %v5121_v43  ;;  %3753 = vmatpush1.bf16.msra.mxu1 %v3752_v41  ;;  %3631 = vmatprep.subr.bf16.mxu0 %v3630_v23  ;;  %v1472_v54 = vrot.slane %v5413_v63, 7  ;;  %v3405_v33 = vpop.f32.mrb[39].mxu0  ;;  %v3758_v43 = vpack.c.bf16 %v3029_v45, %v3027_v62  ;;  %v3028_v41 = vld [vmem:[%s6553_s5 + $0x6f0] sm:$0xff]  ;;  %v3030_v45 = vld [vmem:[%s6553_s5 + $0x700] sm:$0xff] }
 0x160   :  { %1942 = vmatprep.mubr.f32.mxu1 %v6562_v1  ;;  %3755 = vmatprep.subr.bf16.mxu1 %v3754_v38  ;;  %v3033_v38 = vld [vmem:[%s6553_s5 + $0x718] sm:$0xff]  ;;  %v3636_v30 = vpack.c.bf16 %v1618_v15, %v1616_v31  ;;  %v3638_v42 = vpack.c.bf16 %v1623_v3, %v1621_v50  ;;  %v1622_v62 = vld [vmem:[%s6553_s5 + $0x330] sm:$0xff]  ;;  %v1624_v33 = vld [vmem:[%s6553_s5 + $0x340] sm:$0xff] }
 0x161   :  { %v5445_v23 = vmul.f32 %v1248_v51, %v1166_v49  ;;  %v1146_v13 = vadd.f32 %v5288_v24, %v1094_v21  ;;  %v1473_v47 = vsel %vm82_vm0, %v1462_v12, %v1472_v54  ;;  %v3760_v12 = vpack.c.bf16 %v3028_v41, %v3026_v22  ;;  %v3032_v36 = vld [vmem:[%s6553_s5 + $0x710] sm:$0xff]  ;;  %v1627_v21 = vld [vmem:[%s6553_s5 + $0x358] sm:$0xff]  ;;  %v3034_v41 = vld [vmem:[%s6553_s5 + $0x720] sm:$0xff] }
 0x162   :  { %3633 = vmatpush1.bf16.msra.mxu0 %v3632_v60  ;;  %3104 = vmatmul.mubr.msk.f32.gmra.mrb[24].mxu1 %vm1664_vm5, %v1473_v47  ;;  %v3762_v10 = vpack.c.bf16 %v3033_v38, %v3031_v6  ;;  %v1625_v60 = vld [vmem:[%s6553_s5 + $0x348] sm:$0xff]  ;;  %v3037_v31 = vld [vmem:[%s6553_s5 + $0x738] sm:$0xff]  ;;  %v3640_v15 = vpack.c.bf16 %v1622_v62, %v1620_v56  ;;  %v3764_v22 = vpack.c.bf16 %v3032_v36, %v3030_v45  ;;  %v1630_v56 = vld [vmem:[%s6553_s5 + $0x370] sm:$0xff] }
 0x163   :  { %v1171_v51 = vmax.f32 %v1146_v13, 0.0  ;;  %3757 = vmatpush1.bf16.msra.mxu1 %v3756_v53  ;;  %3635 = vmatprep.subr.bf16.mxu0 %v3634_v27  ;;  %v1482_v24 = vrot.slane %v5445_v23, 7  ;;  %v3035_v27 = vld [vmem:[%s6553_s5 + $0x728] sm:$0xff]  ;;  %v3642_v50 = vpack.c.bf16 %v1627_v21, %v1625_v60  ;;  %v3036_v13 = vld [vmem:[%s6553_s5 + $0x730] sm:$0xff]  ;;  %v1631_v6 = vld [vmem:[%s6553_s5 + $0x378] sm:$0xff] }
 0x164   :  { %1948 = vmatprep.mubr.f32.mxu1 %v6562_v1  ;;  %3759 = vmatprep.subr.bf16.mxu1 %v3758_v43  ;;  %v1626_v43 = vld [vmem:[%s6553_s5 + $0x350] sm:$0xff]  ;;  %v3766_v3 = vpack.c.bf16 %v3037_v31, %v3035_v27  ;;  %v1629_v47 = vld [vmem:[%s6553_s5 + $0x368] sm:$0xff]  ;;  %v3038_v62 = vld [vmem:[%s6553_s5 + $0x740] sm:$0xff] }
 0x165   :  { %v5475_v53 = vmul.f32 %v1253_v0, %v1171_v51  ;;  %v1483_v49 = vsel %vm82_vm0, %v1472_v54, %v1482_v24  ;;  %v3039_v0 = vld [vmem:[%s6553_s5 + $0x748] sm:$0xff]  ;;  %v3644_v51 = vpack.c.bf16 %v1626_v43, %v1624_v33  ;;  %v3040_v45 = vld [vmem:[%s6553_s5 + $0x750] sm:$0xff]  ;;  %v1635_v60 = vld [vmem:[%s6553_s5 + $0x398] sm:$0xff] }
 0x166   :  { %3637 = vmatpush1.bf16.msra.mxu0 %v3636_v30  ;;  %3105 = vmatmul.mubr.msk.f32.gmra.mrb[26].mxu1 %vm1664_vm5, %v1483_v49  ;;  %v3041_v30 = vld [vmem:[%s6553_s5 + $0x758] sm:$0xff]  ;;  %v1633_v36 = vld [vmem:[%s6553_s5 + $0x388] sm:$0xff]  ;;  %v3772_v31 = vpack.c.bf16 %v3040_v45, %v3038_v62  ;;  %v3042_v33 = vld [vmem:[%s6553_s5 + $0x760] sm:$0xff] }
 0x167   :  { %3761 = vmatpush1.bf16.msra.mxu1 %v3760_v12  ;;  %3639 = vmatprep.subr.bf16.mxu0 %v3638_v42  ;;  %v1492_v54 = vrot.slane %v5475_v53, 7  ;;  %v3768_v12 = vpack.c.bf16 %v3036_v13, %v3034_v41  ;;  %v3646_v42 = vpack.c.bf16 %v1631_v6, %v1629_v47  ;;  %v3043_v49 = vld [vmem:[%s6553_s5 + $0x768] sm:$0xff]  ;;  %v3045_v21 = vld [vmem:[%s6553_s5 + $0x778] sm:$0xff]  ;;  %v3044_v41 = vld [vmem:[%s6553_s5 + $0x770] sm:$0xff] }
 0x168   :  { %1954 = vmatprep.mubr.f32.mxu1 %v6562_v1  ;;  %3763 = vmatprep.subr.bf16.mxu1 %v3762_v10  ;;  %v3770_v10 = vpack.c.bf16 %v3041_v30, %v3039_v0  ;;  %v3774_v43 = vpack.c.bf16 %v3045_v21, %v3043_v49  ;;  %v3047_v13 = vld [vmem:[%s6553_s5 + $0x788] sm:$0xff]  ;;  %v3049_v47 = vld [vmem:[%s6553_s5 + $0x798] sm:$0xff]  ;;  %v1636_v30 = vld [vmem:[%s6553_s5 + $0x3a0] sm:$0xff] }
 0x169   :  { %v1493_v38 = vsel %vm82_vm0, %v1482_v24, %v1492_v54  ;;  %v1628_v24 = vld [vmem:[%s6553_s5 + $0x360] sm:$0xff]  ;;  %v1643_v62 = vld [vmem:[%s6553_s5 + $0x3d8] sm:$0xff]  ;;  %v3051_v45 = vld [vmem:[%s6553_s5 + $0x7a8] sm:$0xff] }
 0x16a   :  { %3641 = vmatpush1.bf16.msra.mxu0 %v3640_v15  ;;  %3106 = vmatmul.mubr.msk.f32.gmra.mrb[28].mxu1 %vm1664_vm5, %v1493_v38  ;;  %v3648_v27 = vpack.c.bf16 %v1630_v56, %v1628_v24  ;;  %v3650_v15 = vpack.c.bf16 %v1635_v60, %v1633_v36  ;;  %v1632_v54 = vld [vmem:[%s6553_s5 + $0x380] sm:$0xff]  ;;  %v3776_v38 = vpack.c.bf16 %v3044_v41, %v3042_v33  ;;  %v3048_v24 = vld [vmem:[%s6553_s5 + $0x790] sm:$0xff]  ;;  %v1641_v56 = vld [vmem:[%s6553_s5 + $0x3c8] sm:$0xff] }
 0x16b   :  { %3765 = vmatpush1.bf16.msra.mxu1 %v3764_v22  ;;  %2130 = vmatprep.mubr.f32.mxu1 %v5315_v26  ;;  %v1634_v22 = vld [vmem:[%s6553_s5 + $0x390] sm:$0xff]  ;;  %v3053_v36 = vld [vmem:[%s6553_s5 + $0x7b8] sm:$0xff]  ;;  %v3658_v21 = vpack.c.bf16 %v1643_v62, %v1641_v56  ;;  %v1237_v41 = vmul.f32 %v5184_v11, %v5016_v40  ;;  %v1644_v40 = vld [vmem:[%s6553_s5 + $0x3e0] sm:$0xff]  ;;  %v1242_v62 = vmul.f32 %v5184_v11, %v5014_v39 }
 0x16c   :  { %3643 = vmatprep.subr.bf16.mxu0 %v3642_v50  ;;  %3767 = vmatprep.subr.bf16.mxu1 %v3766_v3  ;;  %v1637_v50 = vld [vmem:[%s6553_s5 + $0x3a8] sm:$0xff]  ;;  %v1639_v3 = vld [vmem:[%s6553_s5 + $0x3b8] sm:$0xff]  ;;  %v3652_v6 = vpack.c.bf16 %v1634_v22, %v1632_v54  ;;  %v3052_v54 = vld [vmem:[%s6553_s5 + $0x7b0] sm:$0xff] }
 0x16d   :  { %v3654_v0 = vpack.c.bf16 %v1639_v3, %v1637_v50  ;;  %v1645_v22 = vld [vmem:[%s6553_s5 + $0x3e8] sm:$0xff]  ;;  %v1647_v33 = vld [vmem:[%s6553_s5 + $0x3f8] sm:$0xff]  ;;  %v1135_v50 = vadd.f32 %v5107_v5, %v5219_v55  ;;  %v1646_v5 = vld [vmem:[%s6553_s5 + $0x3f0] sm:$0xff] }
 0x16e   :  { %3645 = vmatpush1.bf16.msra.mxu0 %v3644_v51  ;;  %v1638_v51 = vld [vmem:[%s6553_s5 + $0x3b0] sm:$0xff]  ;;  %v3055_v3 = vld [vmem:[%s6553_s5 + $0x7c8] sm:$0xff]  ;;  %v2950_v39 = vld [vmem:[%s6553_s5 + $0x480] sm:$0xff] }
 0x16f   :  { %3769 = vmatpush1.bf16.msra.mxu1 %v3768_v12  ;;  %3647 = vmatprep.subr.bf16.mxu0 %v3646_v42  ;;  %v3046_v12 = vld [vmem:[%s6553_s5 + $0x780] sm:$0xff]  ;;  %v3778_v42 = vpack.c.bf16 %v3049_v47, %v3047_v13  ;;  %v3656_v60 = vpack.c.bf16 %v1638_v51, %v1636_v30  ;;  %v3057_v13 = vld [vmem:[%s6553_s5 + $0x7d8] sm:$0xff]  ;;  %v3056_v51 = vld [vmem:[%s6553_s5 + $0x7d0] sm:$0xff]  ;;  %v1160_v56 = vmax.f32 %v1135_v50, 0.0 }
 0x170   :  { %3771 = vmatprep.subr.bf16.mxu1 %v3770_v10  ;;  %v1130_v10 = vadd.f32 %v5099_v58, %v5219_v55  ;;  %v3780_v49 = vpack.c.bf16 %v3048_v24, %v3046_v12  ;;  %v1642_v58 = vld [vmem:[%s6553_s5 + $0x3d0] sm:$0xff]  ;;  %v3786_v30 = vpack.c.bf16 %v3057_v13, %v3055_v3  ;;  %v2951_v12 = vld [vmem:[%s6553_s5 + $0x488] sm:$0xff]  ;;  %v3065_v3 = vld [vmem:[%s6553_s5 + $0x818] sm:$0xff] }
 0x171   :  { %v3063_v50 = vld [vmem:[%s6553_s5 + $0x808] sm:$0xff] }
 0x172   :  { %3649 = vmatpush1.bf16.msra.mxu0 %v3648_v27  ;;  %v1640_v27 = vld [vmem:[%s6553_s5 + $0x3c0] sm:$0xff] }
 0x173   :  { %3773 = vmatpush1.bf16.msra.mxu1 %v3772_v31  ;;  %3651 = vmatprep.subr.bf16.mxu0 %v3650_v15  ;;  %v3050_v31 = vld [vmem:[%s6553_s5 + $0x7a0] sm:$0xff]  ;;  %v3782_v15 = vpack.c.bf16 %v3053_v36, %v3051_v45  ;;  %v3660_v47 = vpack.c.bf16 %v1642_v58, %v1640_v27  ;;  %v3059_v45 = vld [vmem:[%s6553_s5 + $0x7e8] sm:$0xff]  ;;  %v3061_v36 = vld [vmem:[%s6553_s5 + $0x7f8] sm:$0xff]  ;;  %v1247_v58 = vmul.f32 %v5184_v11, %v5038_v48 }
 0x174   :  { %3775 = vmatprep.subr.bf16.mxu1 %v3774_v43  ;;  %v1155_v43 = vmax.f32 %v1130_v10, 0.0  ;;  %v1140_v10 = vadd.f32 %v5115_v16, %v5219_v55  ;;  %v2952_v16 = vld [vmem:[%s6553_s5 + $0x490] sm:$0xff]  ;;  %v3058_v27 = vld [vmem:[%s6553_s5 + $0x7e0] sm:$0xff]  ;;  %v1145_v48 = vadd.f32 %v5123_v37, %v5219_v55 }
 0x175   :  { %v3684_v13 = vpack.c.bf16 %v2952_v16, %v2950_v39  ;;  %v2954_v37 = vld [vmem:[%s6553_s5 + $0x4a0] sm:$0xff]  ;;  %v2956_v55 = vld [vmem:[%s6553_s5 + $0x4b0] sm:$0xff]  ;;  %v1468_v16 = vrot.slane %v5118_v17, 7 }
 0x176   :  { %3653 = vmatpush1.bf16.msra.mxu0 %v3652_v6  ;;  %v3784_v6 = vpack.c.bf16 %v3052_v54, %v3050_v31  ;;  %v5637_v24 = vmul.f32 %v1237_v41, %v1155_v43  ;;  %v3790_v31 = vpack.c.bf16 %v3061_v36, %v3059_v45  ;;  %v2955_v54 = vld [vmem:[%s6553_s5 + $0x4a8] sm:$0xff]  ;;  %v1165_v43 = vmax.f32 %v1140_v10, 0.0  ;;  %v3069_v45 = vld [vmem:[%s6553_s5 + $0x838] sm:$0xff] }
 0x177   :  { %3777 = vmatpush1.bf16.msra.mxu1 %v3776_v38  ;;  %3655 = vmatprep.subr.bf16.mxu0 %v3654_v0  ;;  %v3662_v38 = vpack.c.bf16 %v1647_v33, %v1645_v22  ;;  %v3054_v0 = vld [vmem:[%s6553_s5 + $0x7c0] sm:$0xff]  ;;  %v2957_v22 = vld [vmem:[%s6553_s5 + $0x4b8] sm:$0xff]  ;;  %v5669_v33 = vmul.f32 %v1242_v62, %v1160_v56  ;;  %v1170_v62 = vmax.f32 %v1145_v48, 0.0  ;;  %v3067_v10 = vld [vmem:[%s6553_s5 + $0x828] sm:$0xff]  ;;  %v3688_v36 = vpack.c.bf16 %v2956_v55, %v2954_v37 }
 0x178   :  { %3779 = vmatprep.subr.bf16.mxu1 %v3778_v42  ;;  %v2953_v42 = vld [vmem:[%s6553_s5 + $0x498] sm:$0xff]  ;;  %v1460_v41 = vrot.slane %v5637_v24, 7  ;;  %v5702_v56 = vmul.f32 %v1247_v58, %v1165_v43  ;;  %v3068_v58 = vld [vmem:[%s6553_s5 + $0x830] sm:$0xff]  ;;  %v3071_v48 = vld [vmem:[%s6553_s5 + $0x848] sm:$0xff]  ;;  %v1478_v55 = vrot.slane %v5126_v28, 7 }
 0x17a   :  { %3657 = vmatpush1.bf16.msra.mxu0 %v3656_v60  ;;  %v3664_v60 = vpack.c.bf16 %v1646_v5, %v1644_v40  ;;  %v3062_v40 = vld [vmem:[%s6553_s5 + $0x800] sm:$0xff]  ;;  %v1252_v5 = vmul.f32 %v5184_v11, %v5044_v52  ;;  %v1461_v52 = vsel %vm82_vm0, %v1452_v25, %v1460_v41  ;;  %v1470_v11 = vrot.slane %v5669_v33, 7 }
 0x17b   :  { %3781 = vmatpush1.bf16.msra.mxu1 %v3780_v49  ;;  %3659 = vmatprep.subr.bf16.mxu0 %v3658_v21  ;;  %v3788_v49 = vpack.c.bf16 %v3056_v51, %v3054_v0  ;;  %v3682_v21 = vpack.c.bf16 %v2953_v42, %v2951_v12  ;;  %v1458_v0 = vrot.slane %v5110_v7, 7  ;;  %v3064_v51 = vld [vmem:[%s6553_s5 + $0x810] sm:$0xff]  ;;  %v2959_v12 = vld [vmem:[%s6553_s5 + $0x4c8] sm:$0xff]  ;;  %v2961_v42 = vld [vmem:[%s6553_s5 + $0x4d8] sm:$0xff]  ;;  %v1480_v43 = vrot.slane %v5702_v56, 7 }
 0x17c   :  { %3783 = vmatprep.subr.bf16.mxu1 %v3782_v15  ;;  %v3060_v15 = vld [vmem:[%s6553_s5 + $0x7f0] sm:$0xff]  ;;  %v3796_v14 = vpack.c.bf16 %v3064_v51, %v3062_v40  ;;  %v2958_v25 = vld [vmem:[%s6553_s5 + $0x4c0] sm:$0xff]  ;;  %v2969_v51 = vld [vmem:[%s6553_s5 + $0x518] sm:$0xff] }
 0x17d   :  { %v1469_v37 = vsel %vm82_vm0, %v1458_v0, %v1468_v16 }
 0x17e   :  { %3661 = vmatpush1.bf16.msra.mxu0 %v3660_v47  ;;  %v1451_v47 = vrot.slane %v5102_v59, 7 }
 0x17f   :  { %3785 = vmatpush1.bf16.msra.mxu1 %v3784_v6  ;;  %3663 = vmatprep.subr.bf16.mxu0 %v3662_v38  ;;  %v3792_v6 = vpack.c.bf16 %v3060_v15, %v3058_v27  ;;  %v3686_v38 = vpack.c.bf16 %v2957_v22, %v2955_v54  ;;  %v3798_v27 = vpack.c.bf16 %v3069_v45, %v3067_v10  ;;  %v2965_v15 = vld [vmem:[%s6553_s5 + $0x4f8] sm:$0xff] }
 0x180   :  { %3787 = vmatprep.subr.bf16.mxu1 %v3786_v30  ;;  %v3794_v30 = vpack.c.bf16 %v3065_v3, %v3063_v50  ;;  %v1459_v39 = vsel %vm82_vm0, %v1451_v47, %v1458_v0  ;;  %v5736_v54 = vmul.f32 %v1252_v5, %v1170_v62  ;;  %v1471_v22 = vsel %vm82_vm0, %v1460_v41, %v1470_v11  ;;  %v3073_v50 = vld [vmem:[%s6553_s5 + $0x858] sm:$0xff]  ;;  %v2962_v41 = vld [vmem:[%s6553_s5 + $0x4e0] sm:$0xff]  ;;  %v3072_v5 = vld [vmem:[%s6553_s5 + $0x850] sm:$0xff] }
 0x181   :  { %v3802_v40 = vpack.c.bf16 %v3073_v50, %v3071_v48  ;;  %v3077_v62 = vld [vmem:[%s6553_s5 + $0x878] sm:$0xff]  ;;  %v2970_v50 = vld [vmem:[%s6553_s5 + $0x520] sm:$0xff] }
 0x182   :  { %3665 = vmatpush1.bf16.msra.mxu0 %v3664_v60  ;;  %v3690_v60 = vpack.c.bf16 %v2961_v42, %v2959_v12  ;;  %v1481_v12 = vsel %vm82_vm0, %v1470_v11, %v1480_v43  ;;  %v1490_v0 = vrot.slane %v5736_v54, 7  ;;  %v3075_v42 = vld [vmem:[%s6553_s5 + $0x868] sm:$0xff]  ;;  %v2966_v11 = vld [vmem:[%s6553_s5 + $0x500] sm:$0xff] }
 0x183   :  { %3789 = vmatpush1.bf16.msra.mxu1 %v3788_v49  ;;  %3683 = vmatprep.subr.bf16.mxu0 %v3682_v21  ;;  %v2960_v49 = vld [vmem:[%s6553_s5 + $0x4d0] sm:$0xff]  ;;  %v3066_v21 = vld [vmem:[%s6553_s5 + $0x820] sm:$0xff] }
 0x184   :  { %3791 = vmatprep.subr.bf16.mxu1 %v3790_v31  ;;  %v2963_v31 = vld [vmem:[%s6553_s5 + $0x4e8] sm:$0xff]  ;;  %v3692_v3 = vpack.c.bf16 %v2960_v49, %v2958_v25  ;;  %v1488_v25 = vrot.slane %v5130_v19, 7  ;;  %v3806_v49 = vpack.c.bf16 %v3077_v62, %v3075_v42  ;;  %v3082_v42 = vld [vmem:[%s6553_s5 + $0x8a0] sm:$0xff]  ;;  %v3084_v62 = vld [vmem:[%s6553_s5 + $0x8b0] sm:$0xff] }
 0x185   :  { %3101 = vmatmul.mubr.msk.f32.vlgmr.msra.gmra.mrb[40].mxu0 %vm5188_vm4, %v1451_v47  ;;  %v3694_v47 = vpack.c.bf16 %v2965_v15, %v2963_v31  ;;  %v3081_v31 = vld [vmem:[%s6553_s5 + $0x898] sm:$0xff] }
 0x186   :  { %1841 = vmatprep.mubr.f32.mxu0 %v1461_v52  ;;  %3685 = vmatpush1.bf16.msra.mxu0 %v3684_v13  ;;  %v3800_v13 = vpack.c.bf16 %v3068_v58, %v3066_v21  ;;  %v3076_v21 = vld [vmem:[%s6553_s5 + $0x870] sm:$0xff]  ;;  %v1491_v58 = vsel %vm82_vm0, %v1480_v43, %v1490_v0 }
 0x187   :  { %3793 = vmatpush1.bf16.msra.mxu1 %v3792_v6  ;;  %3687 = vmatprep.subr.bf16.mxu0 %v3686_v38  ;;  %v2964_v6 = vld [vmem:[%s6553_s5 + $0x4f0] sm:$0xff]  ;;  %v3070_v38 = vld [vmem:[%s6553_s5 + $0x840] sm:$0xff] }
 0x188   :  { %3795 = vmatprep.subr.bf16.mxu1 %v3794_v30  ;;  %v2967_v30 = vld [vmem:[%s6553_s5 + $0x508] sm:$0xff]  ;;  %v3696_v52 = vpack.c.bf16 %v2964_v6, %v2962_v41  ;;  %v3804_v10 = vpack.c.bf16 %v3072_v5, %v3070_v38  ;;  %v2972_v43 = vld [vmem:[%s6553_s5 + $0x530] sm:$0xff]  ;;  %v2977_v38 = vld [vmem:[%s6553_s5 + $0x558] sm:$0xff] }
 0x189   :  { %1842 = vmatmul.mubr.f32.gmra.mrb[42].mxu0 %v1459_v39  ;;  %v3698_v45 = vpack.c.bf16 %v2969_v51, %v2967_v30  ;;  %v2971_v39 = vld [vmem:[%s6553_s5 + $0x528] sm:$0xff]  ;;  %v3080_v41 = vld [vmem:[%s6553_s5 + $0x890] sm:$0xff]  ;;  %v2974_v30 = vld [vmem:[%s6553_s5 + $0x540] sm:$0xff] }
 0x18a   :  { %1847 = vmatprep.mubr.f32.mxu0 %v1471_v22  ;;  %3689 = vmatpush1.bf16.msra.mxu0 %v3688_v36  ;;  %v2968_v36 = vld [vmem:[%s6553_s5 + $0x510] sm:$0xff]  ;;  %v2975_v6 = vld [vmem:[%s6553_s5 + $0x548] sm:$0xff] }
 0x18b   :  { %3797 = vmatpush1.bf16.msra.mxu1 %v3796_v14  ;;  %3691 = vmatprep.subr.bf16.mxu0 %v3690_v60  ;;  %v3074_v14 = vld [vmem:[%s6553_s5 + $0x860] sm:$0xff]  ;;  %v1479_v60 = vsel %vm82_vm0, %v1468_v16, %v1478_v55  ;;  %v3079_v16 = vld [vmem:[%s6553_s5 + $0x888] sm:$0xff]  ;;  %v3700_v15 = vpack.c.bf16 %v2968_v36, %v2966_v11  ;;  %v2976_v51 = vld [vmem:[%s6553_s5 + $0x550] sm:$0xff] }
 0x18c   :  { %3799 = vmatprep.subr.bf16.mxu1 %v3798_v27  ;;  %v2973_v27 = vld [vmem:[%s6553_s5 + $0x538] sm:$0xff]  ;;  %v3808_v22 = vpack.c.bf16 %v3076_v21, %v3074_v14  ;;  %v3708_v36 = vpack.c.bf16 %v2976_v51, %v2974_v30  ;;  %v3816_v14 = vpack.c.bf16 %v3084_v62, %v3082_v42  ;;  %v2986_v30 = vld [vmem:[%s6553_s5 + $0x5a0] sm:$0xff]  ;;  %v2988_v51 = vld [vmem:[%s6553_s5 + $0x5b0] sm:$0xff] }
 0x18d   :  { %1848 = vmatmul.mubr.f32.gmra.mrb[44].mxu0 %v1469_v37  ;;  %v3702_v48 = vpack.c.bf16 %v2973_v27, %v2971_v39  ;;  %v3083_v37 = vld [vmem:[%s6553_s5 + $0x8a8] sm:$0xff]  ;;  %v3089_v11 = vld [vmem:[%s6553_s5 + $0x8d8] sm:$0xff] }
 0x18e   :  { %1853 = vmatprep.mubr.f32.mxu0 %v1481_v12  ;;  %3693 = vmatpush1.bf16.msra.mxu0 %v3692_v3  ;;  %v1489_v3 = vsel %vm82_vm0, %v1478_v55, %v1488_v25  ;;  %v3085_v55 = vld [vmem:[%s6553_s5 + $0x8b8] sm:$0xff]  ;;  %v3706_v12 = vpack.c.bf16 %v2977_v38, %v2975_v6  ;;  %v2980_v25 = vld [vmem:[%s6553_s5 + $0x570] sm:$0xff]  ;;  %v2983_v39 = vld [vmem:[%s6553_s5 + $0x588] sm:$0xff] }
 0x18f   :  { %3801 = vmatpush1.bf16.msra.mxu1 %v3800_v13  ;;  %3695 = vmatprep.subr.bf16.mxu0 %v3694_v47  ;;  %v3810_v13 = vpack.c.bf16 %v3081_v31, %v3079_v16  ;;  %v3078_v47 = vld [vmem:[%s6553_s5 + $0x880] sm:$0xff]  ;;  %v3814_v0 = vpack.c.bf16 %v3085_v55, %v3083_v37  ;;  %v2985_v27 = vld [vmem:[%s6553_s5 + $0x598] sm:$0xff]  ;;  %v3088_v16 = vld [vmem:[%s6553_s5 + $0x8d0] sm:$0xff] }
 0x190   :  { %3803 = vmatprep.subr.bf16.mxu1 %v3802_v40  ;;  %v3704_v40 = vpack.c.bf16 %v2972_v43, %v2970_v50  ;;  %v3812_v5 = vpack.c.bf16 %v3080_v41, %v3078_v47  ;;  %v2982_v50 = vld [vmem:[%s6553_s5 + $0x580] sm:$0xff]  ;;  %v2984_v43 = vld [vmem:[%s6553_s5 + $0x590] sm:$0xff]  ;;  %v2989_v47 = vld [vmem:[%s6553_s5 + $0x5b8] sm:$0xff] }
 0x191   :  { %1854 = vmatmul.mubr.f32.gmra.mrb[46].mxu0 %v1479_v60  ;;  %v2978_v60 = vld [vmem:[%s6553_s5 + $0x560] sm:$0xff]  ;;  %v3092_v38 = vld [vmem:[%s6553_s5 + $0x8f0] sm:$0xff]  ;;  %v3716_v37 = vpack.c.bf16 %v2984_v43, %v2982_v50  ;;  %v3113_v55 = vld [vmem:[%s6553_s5 + $0x908] sm:$0xff] }
 0x192   :  { %1859 = vmatprep.mubr.f32.mxu0 %v1491_v58  ;;  %3697 = vmatpush1.bf16.msra.mxu0 %v3696_v52  ;;  %v2979_v52 = vld [vmem:[%s6553_s5 + $0x568] sm:$0xff]  ;;  %v3086_v58 = vld [vmem:[%s6553_s5 + $0x8c0] sm:$0xff]  ;;  %v3712_v31 = vpack.c.bf16 %v2980_v25, %v2978_v60  ;;  %v2993_v42 = vld [vmem:[%s6553_s5 + $0x5d8] sm:$0xff] }
 0x193   :  { %3805 = vmatpush1.bf16.msra.mxu1 %v3804_v10  ;;  %3699 = vmatprep.subr.bf16.mxu0 %v3698_v45  ;;  %v2981_v10 = vld [vmem:[%s6553_s5 + $0x578] sm:$0xff]  ;;  %v3087_v45 = vld [vmem:[%s6553_s5 + $0x8c8] sm:$0xff]  ;;  %v3090_v6 = vld [vmem:[%s6553_s5 + $0x8e0] sm:$0xff] }
 0x194   :  { %3807 = vmatprep.subr.bf16.mxu1 %v3806_v49  ;;  %v3710_v49 = vpack.c.bf16 %v2981_v10, %v2979_v52  ;;  %v3818_v21 = vpack.c.bf16 %v3089_v11, %v3087_v45  ;;  %v3720_v52 = vpack.c.bf16 %v2988_v51, %v2986_v30  ;;  %v2990_v45 = vld [vmem:[%s6553_s5 + $0x5c0] sm:$0xff]  ;;  %v2992_v11 = vld [vmem:[%s6553_s5 + $0x5d0] sm:$0xff]  ;;  %v2995_v60 = vld [vmem:[%s6553_s5 + $0x5e8] sm:$0xff] }
 0x195   :  { %1860 = vmatmul.mubr.f32.gmra.mrb[48].mxu0 %v1489_v3  ;;  %v3820_v3 = vpack.c.bf16 %v3088_v16, %v3086_v58  ;;  %v2997_v25 = vld [vmem:[%s6553_s5 + $0x5f8] sm:$0xff]  ;;  %v2994_v16 = vld [vmem:[%s6553_s5 + $0x5e0] sm:$0xff]  ;;  %v2999_v50 = vld [vmem:[%s6553_s5 + $0x608] sm:$0xff] }
 0x196   :  { %3701 = vmatpush1.bf16.msra.mxu0 %v3700_v15  ;;  %2035 = vmatprep.mubr.f32.mxu0 %v5172_v2  ;;  %v3091_v15 = vld [vmem:[%s6553_s5 + $0x8e8] sm:$0xff]  ;;  %v3726_v58 = vpack.c.bf16 %v2997_v25, %v2995_v60  ;;  %v3001_v43 = vld [vmem:[%s6553_s5 + $0x618] sm:$0xff] }
 0x197   :  { %3809 = vmatpush1.bf16.msra.mxu1 %v3808_v22  ;;  %3703 = vmatprep.subr.bf16.mxu0 %v3702_v48  ;;  %v3093_v22 = vld [vmem:[%s6553_s5 + $0x8f8] sm:$0xff]  ;;  %v3714_v48 = vpack.c.bf16 %v2985_v27, %v2983_v39  ;;  %v3724_v39 = vpack.c.bf16 %v2992_v11, %v2990_v45  ;;  %v3003_v30 = vld [vmem:[%s6553_s5 + $0x628] sm:$0xff]  ;;  %v3004_v45 = vld [vmem:[%s6553_s5 + $0x630] sm:$0xff] }
 0x198   :  { %3811 = vmatprep.subr.bf16.mxu1 %v3810_v13  ;;  %v2987_v13 = vld [vmem:[%s6553_s5 + $0x5a8] sm:$0xff]  ;;  %v3822_v41 = vpack.c.bf16 %v3093_v22, %v3091_v15  ;;  %v3116_v15 = vld [vmem:[%s6553_s5 + $0x920] sm:$0xff]  ;;  %v3005_v51 = vld [vmem:[%s6553_s5 + $0x638] sm:$0xff] }
 0x199   :  { %v3124_v11 = vld [vmem:[%s6553_s5 + $0x960] sm:$0xff]  ;;  %v3007_v60 = vld [vmem:[%s6553_s5 + $0x648] sm:$0xff]  ;;  %v3009_v25 = vld [vmem:[%s6553_s5 + $0x658] sm:$0xff] }
 0x19a   :  { %3705 = vmatpush1.bf16.msra.mxu0 %v3704_v40  ;;  %2131 = vmatmul.mubr.f32.vlgmr.msra.gmra.mrb[30].mxu1 %v5102_v59  ;;  %v3115_v40 = vld [vmem:[%s6553_s5 + $0x918] sm:$0xff] }
 0x19b   :  { %2136 = vmatprep.mubr.f32.mxu1 %v5637_v24  ;;  %3813 = vmatpush1.bf16.msra.mxu1 %v3812_v5  ;;  %v3718_v5 = vpack.c.bf16 %v2989_v47, %v2987_v13  ;;  %v3826_v62 = vpack.c.bf16 %v3115_v40, %v3113_v55  ;;  %v3123_v13 = vld [vmem:[%s6553_s5 + $0x958] sm:$0xff]  ;;  %v3120_v55 = vld [vmem:[%s6553_s5 + $0x940] sm:$0xff] }
 0x19c   :  { %3707 = vmatprep.subr.bf16.mxu0 %v3706_v12  ;;  %3815 = vmatprep.subr.bf16.mxu1 %v3814_v0  ;;  %v3824_v12 = vpack.c.bf16 %v3092_v38, %v3090_v6  ;;  %v2991_v0 = vld [vmem:[%s6553_s5 + $0x5c8] sm:$0xff]  ;;  %v3730_v6 = vpack.c.bf16 %v3001_v43, %v2999_v50  ;;  %v2998_v38 = vld [vmem:[%s6553_s5 + $0x600] sm:$0xff]  ;;  %v3013_v43 = vld [vmem:[%s6553_s5 + $0x678] sm:$0xff] }
 0x19d   :  { %v3722_v10 = vpack.c.bf16 %v2993_v42, %v2991_v0  ;;  %v3127_v0 = vld [vmem:[%s6553_s5 + $0x978] sm:$0xff]  ;;  %v3011_v50 = vld [vmem:[%s6553_s5 + $0x668] sm:$0xff] }
 0x19e   :  { %3709 = vmatpush1.bf16.msra.mxu0 %v3708_v36  ;;  %2137 = vmatmul.mubr.f32.gmra.mrb[32].mxu1 %v5110_v7  ;;  %v3112_v36 = vld [vmem:[%s6553_s5 + $0x900] sm:$0xff] }
 0x19f   :  { %2142 = vmatprep.mubr.f32.mxu1 %v5669_v33  ;;  %3817 = vmatpush1.bf16.msra.mxu1 %v3816_v14  ;;  %v3114_v14 = vld [vmem:[%s6553_s5 + $0x910] sm:$0xff] }
 0x1a0   :  { %3711 = vmatprep.subr.bf16.mxu0 %v3710_v49  ;;  %3819 = vmatprep.subr.bf16.mxu1 %v3818_v21  ;;  %v3117_v49 = vld [vmem:[%s6553_s5 + $0x928] sm:$0xff]  ;;  %v3119_v21 = vld [vmem:[%s6553_s5 + $0x938] sm:$0xff]  ;;  %v3828_v27 = vpack.c.bf16 %v3114_v14, %v3112_v36  ;;  %v3126_v14 = vld [vmem:[%s6553_s5 + $0x970] sm:$0xff] }
 0x1a1   :  { %v3830_v22 = vpack.c.bf16 %v3119_v21, %v3117_v49  ;;  %v3129_v49 = vld [vmem:[%s6553_s5 + $0x988] sm:$0xff]  ;;  %v3131_v21 = vld [vmem:[%s6553_s5 + $0x998] sm:$0xff] }
 0x1a2   :  { %3713 = vmatpush1.bf16.msra.mxu0 %v3712_v31  ;;  %2143 = vmatmul.mubr.f32.gmra.mrb[34].mxu1 %v5118_v17  ;;  %v2996_v31 = vld [vmem:[%s6553_s5 + $0x5f0] sm:$0xff] }
 0x1a3   :  { %2148 = vmatprep.mubr.f32.mxu1 %v5702_v56  ;;  %3715 = vmatprep.subr.bf16.mxu0 %v3714_v48  ;;  %v3118_v48 = vld [vmem:[%s6553_s5 + $0x930] sm:$0xff]  ;;  %v3728_v47 = vpack.c.bf16 %v2996_v31, %v2994_v16  ;;  %v3006_v16 = vld [vmem:[%s6553_s5 + $0x640] sm:$0xff] }
 0x1a4   :  { %3821 = vmatpush1.bf16.msra.mxu1 %v3820_v3  ;;  %v3121_v3 = vld [vmem:[%s6553_s5 + $0x948] sm:$0xff]  ;;  %v3008_v31 = vld [vmem:[%s6553_s5 + $0x650] sm:$0xff] }
 0x1a5   :  { %3823 = vmatprep.subr.bf16.mxu1 %v3822_v41  ;;  %v3832_v41 = vpack.c.bf16 %v3118_v48, %v3116_v15  ;;  %v3834_v40 = vpack.c.bf16 %v3123_v13, %v3121_v3  ;;  %v3842_v15 = vpack.c.bf16 %v3131_v21, %v3129_v49  ;;  %v3130_v48 = vld [vmem:[%s6553_s5 + $0x990] sm:$0xff]  ;;  %v3133_v3 = vld [vmem:[%s6553_s5 + $0x9a8] sm:$0xff]  ;;  %v3135_v13 = vld [vmem:[%s6553_s5 + $0x9b8] sm:$0xff] }
 0x1a6   :  { %3717 = vmatpush1.bf16.msra.mxu0 %v3716_v37  ;;  %2149 = vmatmul.mubr.f32.gmra.mrb[36].mxu1 %v5126_v28  ;;  %v3000_v37 = vld [vmem:[%s6553_s5 + $0x610] sm:$0xff]  ;;  %v3145_v21 = vld [vmem:[%s6553_s5 + $0xa08] sm:$0xff] }
 0x1a7   :  { %2154 = vmatprep.mubr.f32.mxu1 %v5736_v54  ;;  %3719 = vmatprep.subr.bf16.mxu0 %v3718_v5  ;;  %v3122_v5 = vld [vmem:[%s6553_s5 + $0x950] sm:$0xff]  ;;  %v3732_v42 = vpack.c.bf16 %v3000_v37, %v2998_v38  ;;  %v3010_v38 = vld [vmem:[%s6553_s5 + $0x660] sm:$0xff] }
 0x1a8   :  { %3825 = vmatpush1.bf16.msra.mxu1 %v3824_v12  ;;  %v3125_v12 = vld [vmem:[%s6553_s5 + $0x968] sm:$0xff]  ;;  %v3012_v37 = vld [vmem:[%s6553_s5 + $0x670] sm:$0xff] }
 0x1a9   :  { %3827 = vmatprep.subr.bf16.mxu1 %v3826_v62  ;;  %v3836_v62 = vpack.c.bf16 %v3122_v5, %v3120_v55  ;;  %v3838_v36 = vpack.c.bf16 %v3127_v0, %v3125_v12  ;;  %v2259_v55 = vrot.slane %v5172_v2, 1  ;;  %v3846_v5 = vpack.c.bf16 %v3135_v13, %v3133_v3  ;;  %v3137_v12 = vld [vmem:[%s6553_s5 + $0x9c8] sm:$0xff]  ;;  %v3139_v0 = vld [vmem:[%s6553_s5 + $0x9d8] sm:$0xff]  ;;  %v3142_v49 = vld [vmem:[%s6553_s5 + $0x9f0] sm:$0xff] }
 0x1aa   :  { %3721 = vmatpush1.bf16.msra.mxu0 %v3720_v52  ;;  %2155 = vmatmul.mubr.f32.gmra.mrb[38].mxu1 %v5130_v19  ;;  %v3734_v52 = vpack.c.bf16 %v3005_v51, %v3003_v30  ;;  %v3132_v30 = vld [vmem:[%s6553_s5 + $0x9a0] sm:$0xff]  ;;  %v3134_v51 = vld [vmem:[%s6553_s5 + $0x9b0] sm:$0xff]  ;;  %v3153_v13 = vld [vmem:[%s6553_s5 + $0xa48] sm:$0xff] }
 0x1ab   :  { %3723 = vmatprep.subr.bf16.mxu0 %v3722_v10  ;;  %2225 = vmatprep.mubr.f32.mxu1 %v6562_v1  ;;  %v3002_v10 = vld [vmem:[%s6553_s5 + $0x620] sm:$0xff]  ;;  %v3150_v3 = vld [vmem:[%s6553_s5 + $0xa30] sm:$0xff] }
 0x1ae   :  { %3725 = vmatpush1.bf16.msra.mxu0 %v3724_v39  ;;  %3107 = vmatmul.mubr.msk.f32.vlgmr.msra.gmra.mrb[30].mxu1 %vm1664_vm5, %v5340_v4  ;;  %v3736_v39 = vpack.c.bf16 %v3004_v45, %v3002_v10  ;;  %v3136_v10 = vld [vmem:[%s6553_s5 + $0x9c0] sm:$0xff]  ;;  %v3138_v45 = vld [vmem:[%s6553_s5 + $0x9d0] sm:$0xff] }
 0x1af   :  { %3829 = vmatpush1.bf16.msra.mxu1 %v3828_v27  ;;  %3727 = vmatprep.subr.bf16.mxu0 %v3726_v58  ;;  %v3840_v27 = vpack.c.bf16 %v3126_v14, %v3124_v11  ;;  %v3738_v58 = vpack.c.bf16 %v3009_v25, %v3007_v60  ;;  %v3141_v11 = vld [vmem:[%s6553_s5 + $0x9e8] sm:$0xff]  ;;  %v3852_v14 = vpack.c.bf16 %v3138_v45, %v3136_v10  ;;  %v3140_v25 = vld [vmem:[%s6553_s5 + $0x9e0] sm:$0xff]  ;;  %v3162_v45 = vld [vmem:[%s6553_s5 + $0xa90] sm:$0xff] }
 0x1b0   :  { %2231 = vmatprep.mubr.f32.mxu1 %v6562_v1  ;;  %3831 = vmatprep.subr.bf16.mxu1 %v3830_v22  ;;  %v3128_v22 = vld [vmem:[%s6553_s5 + $0x980] sm:$0xff] }
 0x1b1   :  { %v3160_v10 = vld [vmem:[%s6553_s5 + $0xa80] sm:$0xff] }
 0x1b2   :  { %3729 = vmatpush1.bf16.msra.mxu0 %v3728_v47  ;;  %3108 = vmatmul.mubr.msk.f32.gmra.mrb[32].mxu1 %vm1664_vm5, %v5377_v20  ;;  %v3740_v47 = vpack.c.bf16 %v3008_v31, %v3006_v16  ;;  %v3144_v16 = vld [vmem:[%s6553_s5 + $0xa00] sm:$0xff]  ;;  %v3146_v31 = vld [vmem:[%s6553_s5 + $0xa10] sm:$0xff] }
 0x1b3   :  { %3833 = vmatpush1.bf16.msra.mxu1 %v3832_v41  ;;  %3731 = vmatprep.subr.bf16.mxu0 %v3730_v6  ;;  %v2260_v41 = vrot.slane %v5205_v46, 1  ;;  %v3844_v6 = vpack.c.bf16 %v3130_v48, %v3128_v22  ;;  %v3151_v22 = vld [vmem:[%s6553_s5 + $0xa38] sm:$0xff]  ;;  %v3860_v48 = vpack.c.bf16 %v3146_v31, %v3144_v16  ;;  %v3168_v16 = vld [vmem:[%s6553_s5 + $0xac0] sm:$0xff]  ;;  %v3170_v31 = vld [vmem:[%s6553_s5 + $0xad0] sm:$0xff] }
 0x1b4   :  { %2237 = vmatprep.mubr.f32.mxu1 %v6562_v1  ;;  %3835 = vmatprep.subr.bf16.mxu1 %v3834_v40  ;;  %v3742_v40 = vpack.c.bf16 %v3013_v43, %v3011_v50  ;;  %v3148_v43 = vld [vmem:[%s6553_s5 + $0xa20] sm:$0xff] }
 0x1b5   :  { %v2261_v2 = vsel %vm721_vm3, %v2259_v55, %v2260_v41  ;;  %v3154_v55 = vld [vmem:[%s6553_s5 + $0xa50] sm:$0xff] }
 0x1b6   :  { %3733 = vmatpush1.bf16.msra.mxu0 %v3732_v42  ;;  %3109 = vmatmul.mubr.msk.f32.gmra.mrb[34].mxu1 %vm1664_vm5, %v5413_v63  ;;  %v3744_v42 = vpack.c.bf16 %v3012_v37, %v3010_v38  ;;  %v3152_v37 = vld [vmem:[%s6553_s5 + $0xa40] sm:$0xff] }
 0x1b7   :  { %3837 = vmatpush1.bf16.msra.mxu1 %v3836_v62  ;;  %3735 = vmatprep.subr.bf16.mxu0 %v3734_v52  ;;  %v3848_v62 = vpack.c.bf16 %v3134_v51, %v3132_v30  ;;  %v3850_v52 = vpack.c.bf16 %v3139_v0, %v3137_v12  ;;  %v3868_v30 = vpack.c.bf16 %v3154_v55, %v3152_v37  ;;  %v3156_v12 = vld [vmem:[%s6553_s5 + $0xa60] sm:$0xff]  ;;  %v3158_v0 = vld [vmem:[%s6553_s5 + $0xa70] sm:$0xff] }
 0x1b8   :  { %2243 = vmatprep.mubr.f32.mxu1 %v6562_v1  ;;  %3839 = vmatprep.subr.bf16.mxu1 %v3838_v36  ;;  %v3143_v36 = vld [vmem:[%s6553_s5 + $0x9f8] sm:$0xff]  ;;  %v3176_v37 = vld [vmem:[%s6553_s5 + $0xb00] sm:$0xff]  ;;  %v3178_v55 = vld [vmem:[%s6553_s5 + $0xb10] sm:$0xff] }
 0x1b9   :  { %v3854_v60 = vpack.c.bf16 %v3143_v36, %v3141_v11  ;;  %v3165_v11 = vld [vmem:[%s6553_s5 + $0xaa8] sm:$0xff]  ;;  %v3167_v36 = vld [vmem:[%s6553_s5 + $0xab8] sm:$0xff] }
 0x1ba   :  { %3737 = vmatpush1.bf16.msra.mxu0 %v3736_v39  ;;  %3110 = vmatmul.mubr.msk.f32.gmra.mrb[36].mxu1 %vm1664_vm5, %v5445_v23  ;;  %v3147_v39 = vld [vmem:[%s6553_s5 + $0xa18] sm:$0xff] }
 0x1bb   :  { %3841 = vmatpush1.bf16.msra.mxu1 %v3840_v27  ;;  %3739 = vmatprep.subr.bf16.mxu0 %v3738_v58  ;;  %v3856_v27 = vpack.c.bf16 %v3142_v49, %v3140_v25  ;;  %v3858_v58 = vpack.c.bf16 %v3147_v39, %v3145_v21  ;;  %v3164_v25 = vld [vmem:[%s6553_s5 + $0xaa0] sm:$0xff]  ;;  %v3166_v49 = vld [vmem:[%s6553_s5 + $0xab0] sm:$0xff]  ;;  %v3169_v21 = vld [vmem:[%s6553_s5 + $0xac8] sm:$0xff] }
 0x1bc   :  { %2249 = vmatprep.mubr.f32.mxu1 %v6562_v1  ;;  %3843 = vmatprep.subr.bf16.mxu1 %v3842_v15  ;;  %v3149_v15 = vld [vmem:[%s6553_s5 + $0xa28] sm:$0xff]  ;;  %v3171_v39 = vld [vmem:[%s6553_s5 + $0xad8] sm:$0xff] }
 0x1bd   :  { %v3862_v50 = vpack.c.bf16 %v3151_v22, %v3149_v15  ;;  %v3173_v15 = vld [vmem:[%s6553_s5 + $0xae8] sm:$0xff]  ;;  %v3175_v22 = vld [vmem:[%s6553_s5 + $0xaf8] sm:$0xff] }
 0x1be   :  { %3741 = vmatpush1.bf16.msra.mxu0 %v3740_v47  ;;  %3111 = vmatmul.mubr.msk.f32.gmra.mrb[38].mxu1 %vm1664_vm5, %v5475_v53  ;;  %v3155_v47 = vld [vmem:[%s6553_s5 + $0xa58] sm:$0xff] }
 0x1bf   :  { %3845 = vmatpush1.bf16.msra.mxu1 %v3844_v6  ;;  %2547 = vmatprep.mubr.f32.mxu1 %v2261_v2  ;;  %v3864_v6 = vpack.c.bf16 %v3150_v3, %v3148_v43  ;;  %v3866_v38 = vpack.c.bf16 %v3155_v47, %v3153_v13  ;;  %v3161_v2 = vld [vmem:[%s6553_s5 + $0xa88] sm:$0xff]  ;;  %v3172_v43 = vld [vmem:[%s6553_s5 + $0xae0] sm:$0xff]  ;;  %v3174_v3 = vld [vmem:[%s6553_s5 + $0xaf0] sm:$0xff] }
 0x1c0   :  { %3743 = vmatprep.subr.bf16.mxu0 %v3742_v40  ;;  %3847 = vmatprep.subr.bf16.mxu1 %v3846_v5  ;;  %v3157_v40 = vld [vmem:[%s6553_s5 + $0xa68] sm:$0xff]  ;;  %v3159_v5 = vld [vmem:[%s6553_s5 + $0xa78] sm:$0xff] }
 0x1c1   :  { %v3870_v51 = vpack.c.bf16 %v3159_v5, %v3157_v40  ;;  %v3177_v13 = vld [vmem:[%s6553_s5 + $0xb08] sm:$0xff]  ;;  %v3179_v47 = vld [vmem:[%s6553_s5 + $0xb18] sm:$0xff]  ;;  %v2257_v40 = vrot.slane %v5196_v32, 1 }
 0x1c2   :  { %3745 = vmatpush1.bf16.msra.mxu0 %v3744_v42  ;;  %v3163_v42 = vld [vmem:[%s6553_s5 + $0xa98] sm:$0xff]  ;;  %v3181_v5 = vld [vmem:[%s6553_s5 + $0xb28] sm:$0xff] }
 0x1c3   :  { %3849 = vmatpush1.bf16.msra.mxu1 %v3848_v62  ;;  %v3872_v62 = vpack.c.bf16 %v3158_v0, %v3156_v12  ;;  %v2256_v12 = vrot.slane %v5161_v57, 1  ;;  %v3892_v0 = vpack.c.bf16 %v3178_v55, %v3176_v37  ;;  %v3196_v55 = vld [vmem:[%s6553_s5 + $0xba0] sm:$0xff] }
 0x1c4   :  { %3851 = vmatprep.subr.bf16.mxu1 %v3850_v52  ;;  %v3874_v52 = vpack.c.bf16 %v3163_v42, %v3161_v2  ;;  %v3182_v42 = vld [vmem:[%s6553_s5 + $0xb30] sm:$0xff] }
 0x1c5   :  { %2036 = vmatmul.mubr.f32.vlgmr.msra.gmra.mrb[50].mxu0 %v5161_v57  ;;  %v3185_v57 = vld [vmem:[%s6553_s5 + $0xb48] sm:$0xff] }
 0x1c6   :  { %2041 = vmatprep.mubr.f32.mxu0 %v5205_v46  ;;  %v2281_v46 = vrot.slane %v5270_v35, 1 }
 0x1c7   :  { %3853 = vmatpush1.bf16.msra.mxu1 %v3852_v14  ;;  %v3876_v14 = vpack.c.bf16 %v3162_v45, %v3160_v10  ;;  %v2283_v45 = vrot.slane %v5273_v8, 1 }
 0x1c8   :  { %3855 = vmatprep.subr.bf16.mxu1 %v3854_v60  ;;  %v3878_v60 = vpack.c.bf16 %v3167_v36, %v3165_v11  ;;  %v3184_v36 = vld [vmem:[%s6553_s5 + $0xb40] sm:$0xff] }
 0x1c9   :  { %2042 = vmatmul.mubr.f32.gmra.mrb[52].mxu0 %v5196_v32  ;;  %v3180_v32 = vld [vmem:[%s6553_s5 + $0xb20] sm:$0xff] }
 0x1ca   :  { %2047 = vmatprep.mubr.f32.mxu0 %v5245_v29  ;;  %v3896_v11 = vpack.c.bf16 %v3182_v42, %v3180_v32  ;;  %v3205_v32 = vld [vmem:[%s6553_s5 + $0xbe8] sm:$0xff]  ;;  %v3207_v42 = vld [vmem:[%s6553_s5 + $0xbf8] sm:$0xff] }
 0x1cb   :  { %3857 = vmatpush1.bf16.msra.mxu1 %v3856_v27  ;;  %v3880_v27 = vpack.c.bf16 %v3166_v49, %v3164_v25  ;;  %v2293_v49 = vrot.slane %v5302_v61, 1 }
 0x1cc   :  { %3859 = vmatprep.subr.bf16.mxu1 %v3858_v58  ;;  %v3882_v58 = vpack.c.bf16 %v3171_v39, %v3169_v21 }
 0x1cd   :  { %2048 = vmatmul.mubr.f32.gmra.mrb[54].mxu0 %v5240_v9 }
 0x1ce   :  { %2053 = vmatprep.mubr.f32.mxu0 %v5273_v8  ;;  %v3189_v8 = vld [vmem:[%s6553_s5 + $0xb68] sm:$0xff] }
 0x1cf   :  { %3861 = vmatpush1.bf16.msra.mxu1 %v3860_v48  ;;  %v3884_v48 = vpack.c.bf16 %v3170_v31, %v3168_v16  ;;  %v2291_v16 = vrot.slane %v5299_v18, 1  ;;  %v3195_v31 = vld [vmem:[%s6553_s5 + $0xb98] sm:$0xff] }
 0x1d0   :  { %3863 = vmatprep.subr.bf16.mxu1 %v3862_v50  ;;  %v3886_v50 = vpack.c.bf16 %v3175_v22, %v3173_v15  ;;  %v2294_v15 = vsel %vm721_vm3, %v2283_v45, %v2293_v49 }
 0x1d1   :  { %2054 = vmatmul.mubr.f32.gmra.mrb[56].mxu0 %v5270_v35  ;;  %v3188_v35 = vld [vmem:[%s6553_s5 + $0xb60] sm:$0xff] }
 0x1d2   :  { %2059 = vmatprep.mubr.f32.mxu0 %v5302_v61  ;;  %v3193_v61 = vld [vmem:[%s6553_s5 + $0xb88] sm:$0xff] }
 0x1d3   :  { %3865 = vmatpush1.bf16.msra.mxu1 %v3864_v6  ;;  %v3888_v6 = vpack.c.bf16 %v3174_v3, %v3172_v43  ;;  %v2292_v43 = vsel %vm721_vm3, %v2281_v46, %v2291_v16  ;;  %v3197_v3 = vld [vmem:[%s6553_s5 + $0xba8] sm:$0xff] }
 0x1d4   :  { %3867 = vmatprep.subr.bf16.mxu1 %v3866_v38  ;;  %v3890_v38 = vpack.c.bf16 %v3179_v47, %v3177_v13  ;;  %v3199_v13 = vld [vmem:[%s6553_s5 + $0xbb8] sm:$0xff]  ;;  %v2266_v47 = vrot.slane %v5637_v24, 1 }
 0x1d5   :  { %2060 = vmatmul.mubr.f32.gmra.mrb[58].mxu0 %v5299_v18  ;;  %v3192_v18 = vld [vmem:[%s6553_s5 + $0xb80] sm:$0xff]  ;;  %v3910_v37 = vpack.c.bf16 %v3199_v13, %v3197_v3 }
 0x1d7   :  { %3869 = vmatpush1.bf16.msra.mxu1 %v3868_v30  ;;  %v3183_v30 = vld [vmem:[%s6553_s5 + $0xb38] sm:$0xff] }
 0x1d8   :  { %3871 = vmatprep.subr.bf16.mxu1 %v3870_v51  ;;  %v2273_v51 = vrot.slane %v5245_v29, 1  ;;  %v3894_v2 = vpack.c.bf16 %v3183_v30, %v3181_v5  ;;  %v3187_v29 = vld [vmem:[%s6553_s5 + $0xb58] sm:$0xff]  ;;  %v3201_v5 = vld [vmem:[%s6553_s5 + $0xbc8] sm:$0xff] }
 0x1d9   :  { %v3203_v30 = vld [vmem:[%s6553_s5 + $0xbd8] sm:$0xff] }
 0x1da   :  { %v2274_v10 = vsel %vm721_vm3, %v2260_v41, %v2273_v51  ;;  %v3191_v41 = vld [vmem:[%s6553_s5 + $0xb78] sm:$0xff]  ;;  %v2284_v25 = vsel %vm721_vm3, %v2273_v51, %v2283_v45 }
 0x1db   :  { %3873 = vmatpush1.bf16.msra.mxu1 %v3872_v62  ;;  %v2258_v62 = vsel %vm721_vm3, %v2256_v12, %v2257_v40  ;;  %v3902_v39 = vpack.c.bf16 %v3191_v41, %v3189_v8  ;;  %v3914_v12 = vpack.c.bf16 %v3203_v30, %v3201_v5  ;;  %v3211_v45 = vld [vmem:[%s6553_s5 + $0xc18] sm:$0xff]  ;;  %v3228_v30 = vld [vmem:[%s6553_s5 + $0xca0] sm:$0xff] }
 0x1dc   :  { %3875 = vmatprep.subr.bf16.mxu1 %v3874_v52  ;;  %v2271_v52 = vrot.slane %v5240_v9, 1  ;;  %v3898_v9 = vpack.c.bf16 %v3187_v29, %v3185_v57  ;;  %v3204_v57 = vld [vmem:[%s6553_s5 + $0xbe0] sm:$0xff]  ;;  %v3206_v29 = vld [vmem:[%s6553_s5 + $0xbf0] sm:$0xff] }
 0x1df   :  { %3877 = vmatpush1.bf16.msra.mxu1 %v3876_v14  ;;  %v3186_v14 = vld [vmem:[%s6553_s5 + $0xb50] sm:$0xff] }
 0x1e0   :  { %3879 = vmatprep.subr.bf16.mxu1 %v3878_v60  ;;  %v2272_v60 = vsel %vm721_vm3, %v2257_v40, %v2271_v52  ;;  %v3900_v21 = vpack.c.bf16 %v3186_v14, %v3184_v36  ;;  %v3198_v40 = vld [vmem:[%s6553_s5 + $0xbb0] sm:$0xff]  ;;  %v3208_v36 = vld [vmem:[%s6553_s5 + $0xc00] sm:$0xff] }
 0x1e1   :  { %v3912_v51 = vpack.c.bf16 %v3198_v40, %v3196_v55  ;;  %v3210_v14 = vld [vmem:[%s6553_s5 + $0xc10] sm:$0xff]  ;;  %v3231_v55 = vld [vmem:[%s6553_s5 + $0xcb8] sm:$0xff] }
 0x1e2   :  { %v3924_v8 = vpack.c.bf16 %v3210_v14, %v3208_v36 }
 0x1e3   :  { %3881 = vmatpush1.bf16.msra.mxu1 %v3880_v27  ;;  %v3190_v27 = vld [vmem:[%s6553_s5 + $0xb70] sm:$0xff] }
 0x1e4   :  { %3883 = vmatprep.subr.bf16.mxu1 %v3882_v58  ;;  %v2282_v58 = vsel %vm721_vm3, %v2271_v52, %v2281_v46  ;;  %v3904_v22 = vpack.c.bf16 %v3190_v27, %v3188_v35  ;;  %v3918_v52 = vpack.c.bf16 %v3207_v42, %v3205_v32  ;;  %v3215_v46 = vld [vmem:[%s6553_s5 + $0xc38] sm:$0xff]  ;;  %v3232_v32 = vld [vmem:[%s6553_s5 + $0xcc0] sm:$0xff]  ;;  %v3234_v42 = vld [vmem:[%s6553_s5 + $0xcd0] sm:$0xff] }
 0x1e7   :  { %3885 = vmatpush1.bf16.msra.mxu1 %v3884_v48  ;;  %v3906_v48 = vpack.c.bf16 %v3195_v31, %v3193_v61  ;;  %v3221_v61 = vld [vmem:[%s6553_s5 + $0xc68] sm:$0xff]  ;;  %v3223_v31 = vld [vmem:[%s6553_s5 + $0xc78] sm:$0xff] }
 0x1e8   :  { %3887 = vmatprep.subr.bf16.mxu1 %v3886_v50  ;;  %v3194_v50 = vld [vmem:[%s6553_s5 + $0xb90] sm:$0xff] }
 0x1eb   :  { %3889 = vmatpush1.bf16.msra.mxu1 %v3888_v6  ;;  %v3908_v6 = vpack.c.bf16 %v3194_v50, %v3192_v18  ;;  %v3222_v18 = vld [vmem:[%s6553_s5 + $0xc70] sm:$0xff]  ;;  %v3225_v50 = vld [vmem:[%s6553_s5 + $0xc88] sm:$0xff] }
 0x1ec   :  { %3891 = vmatprep.subr.bf16.mxu1 %v3890_v38  ;;  %v2265_v38 = vrot.slane %v5315_v26, 1 }
 0x1ee   :  { %2548 = vmatmul.mubr.f32.vlgmr.msra.gmra.mrb[30].mxu1 %v2258_v62  ;;  %v2267_v26 = vsel %vm721_vm3, %v2265_v38, %v2266_v47  ;;  %v3226_v38 = vld [vmem:[%s6553_s5 + $0xc90] sm:$0xff] }
 0x1ef   :  { %2553 = vmatprep.mubr.f32.mxu1 %v2274_v10  ;;  %3893 = vmatpush1.bf16.msra.mxu1 %v3892_v0  ;;  %v3200_v0 = vld [vmem:[%s6553_s5 + $0xbc0] sm:$0xff]  ;;  %v3209_v10 = vld [vmem:[%s6553_s5 + $0xc08] sm:$0xff] }
 0x1f0   :  { %3895 = vmatprep.subr.bf16.mxu1 %v3894_v2  ;;  %v3202_v2 = vld [vmem:[%s6553_s5 + $0xbd0] sm:$0xff] }
 0x1f1   :  { %v3916_v62 = vpack.c.bf16 %v3202_v2, %v3200_v0 }
 0x1f2   :  { %2554 = vmatmul.mubr.f32.gmra.mrb[32].mxu1 %v2272_v60  ;;  %v3213_v60 = vld [vmem:[%s6553_s5 + $0xc28] sm:$0xff] }
 0x1f3   :  { %2559 = vmatprep.mubr.f32.mxu1 %v2284_v25  ;;  %3897 = vmatpush1.bf16.msra.mxu1 %v3896_v11  ;;  %v3920_v11 = vpack.c.bf16 %v3206_v29, %v3204_v57  ;;  %v3926_v41 = vpack.c.bf16 %v3215_v46, %v3213_v60  ;;  %v3212_v25 = vld [vmem:[%s6553_s5 + $0xc20] sm:$0xff]  ;;  %v3948_v57 = vpack.c.bf16 %v3234_v42, %v3232_v32  ;;  %v3242_v46 = vld [vmem:[%s6553_s5 + $0xd10] sm:$0xff]  ;;  %v2269_v42 = vrot.slane %v5377_v20, 1 }
 0x1f4   :  { %3899 = vmatprep.subr.bf16.mxu1 %v3898_v9  ;;  %v3922_v9 = vpack.c.bf16 %v3211_v45, %v3209_v10  ;;  %v3236_v10 = vld [vmem:[%s6553_s5 + $0xce0] sm:$0xff]  ;;  %v3238_v45 = vld [vmem:[%s6553_s5 + $0xcf0] sm:$0xff]  ;;  %v2289_v20 = vrot.slane %v5445_v23, 1 }
 0x1f5   :  { %v3952_v36 = vpack.c.bf16 %v3238_v45, %v3236_v10  ;;  %v3240_v60 = vld [vmem:[%s6553_s5 + $0xd00] sm:$0xff]  ;;  %v2299_v45 = vrot.slane %v5475_v53, 1 }
 0x1f6   :  { %2560 = vmatmul.mubr.f32.gmra.mrb[34].mxu1 %v2282_v58  ;;  %v3216_v58 = vld [vmem:[%s6553_s5 + $0xc40] sm:$0xff] }
 0x1f7   :  { %2565 = vmatprep.mubr.f32.mxu1 %v2294_v15  ;;  %3901 = vmatpush1.bf16.msra.mxu1 %v3900_v21  ;;  %v3217_v21 = vld [vmem:[%s6553_s5 + $0xc48] sm:$0xff]  ;;  %v2326_v23 = vsel %vm721_vm3, %v2299_v45, 0.0 }
 0x1f8   :  { %3903 = vmatprep.subr.bf16.mxu1 %v3902_v39  ;;  %v3219_v39 = vld [vmem:[%s6553_s5 + $0xc58] sm:$0xff] }
 0x1f9   :  { %v3930_v27 = vpack.c.bf16 %v3219_v39, %v3217_v21  ;;  %v2262_v21 = vrot.slane %v5102_v59, 1  ;;  %v3956_v39 = vpack.c.bf16 %v3242_v46, %v3240_v60  ;;  %v3249_v59 = vld [vmem:[%s6553_s5 + $0xd48] sm:$0xff] }
 0x1fa   :  { %2566 = vmatmul.mubr.f32.gmra.mrb[36].mxu1 %v2292_v43  ;;  %v3227_v43 = vld [vmem:[%s6553_s5 + $0xc98] sm:$0xff] }
 0x1fb   :  { %3256 = vmatprep.mubr.msk.f32.mxu1 %vm721_vm3, %v2293_v49  ;;  %3905 = vmatpush1.bf16.msra.mxu1 %v3904_v22  ;;  %v3214_v49 = vld [vmem:[%s6553_s5 + $0xc30] sm:$0xff]  ;;  %v3934_v22 = vpack.c.bf16 %v3223_v31, %v3221_v61  ;;  %v3938_v13 = vpack.c.bf16 %v3227_v43, %v3225_v50  ;;  %v3251_v61 = vld [vmem:[%s6553_s5 + $0xd58] sm:$0xff]  ;;  %v2285_v43 = vrot.slane %v5126_v28, 1  ;;  %v3252_v28 = vld [vmem:[%s6553_s5 + $0xd60] sm:$0xff] }
 0x1fc   :  { %3907 = vmatprep.subr.bf16.mxu1 %v3906_v48  ;;  %v3928_v35 = vpack.c.bf16 %v3214_v49, %v3212_v25  ;;  %v3220_v48 = vld [vmem:[%s6553_s5 + $0xc60] sm:$0xff]  ;;  %v3247_v25 = vld [vmem:[%s6553_s5 + $0xd38] sm:$0xff]  ;;  %v2277_v49 = vrot.slane %v5669_v33, 1  ;;  %v2275_v33 = vrot.slane %v5118_v17, 1  ;;  %v3250_v50 = vld [vmem:[%s6553_s5 + $0xd50] sm:$0xff] }
 0x1fd   :  { %v3936_v3 = vpack.c.bf16 %v3222_v18, %v3220_v48  ;;  %v3962_v48 = vpack.c.bf16 %v3251_v61, %v3249_v59  ;;  %v3248_v18 = vld [vmem:[%s6553_s5 + $0xd40] sm:$0xff] }
 0x1fe   :  { %3257 = vmatmul.mubr.msk.f32.gmra.mrb[38].mxu1 %vm721_vm3, %v2291_v16  ;;  %v3218_v16 = vld [vmem:[%s6553_s5 + $0xc50] sm:$0xff]  ;;  %v2278_v31 = vsel %vm721_vm3, %v2266_v47, %v2277_v49 }
 0x1ff   :  { %3909 = vmatpush1.bf16.msra.mxu1 %v3908_v6  ;;  %2642 = vmatprep.mubr.f32.mxu1 %v2267_v26  ;;  %v3932_v15 = vpack.c.bf16 %v3218_v16, %v3216_v58  ;;  %v3224_v6 = vld [vmem:[%s6553_s5 + $0xc80] sm:$0xff]  ;;  %v3230_v26 = vld [vmem:[%s6553_s5 + $0xcb0] sm:$0xff] }
 0x200   :  { %3911 = vmatprep.subr.bf16.mxu1 %v3910_v37  ;;  %v3229_v37 = vld [vmem:[%s6553_s5 + $0xca8] sm:$0xff]  ;;  %v3940_v40 = vpack.c.bf16 %v3226_v38, %v3224_v6  ;;  %v3944_v0 = vpack.c.bf16 %v3230_v26, %v3228_v30  ;;  %v2297_v38 = vrot.slane %v5736_v54, 1  ;;  %v2295_v26 = vrot.slane %v5130_v19, 1 }
 0x201   :  { %v3942_v5 = vpack.c.bf16 %v3231_v55, %v3229_v37  ;;  %v3964_v37 = vpack.c.bf16 %v3250_v50, %v3248_v18 }
 0x203   :  { %3913 = vmatpush1.bf16.msra.mxu1 %v3912_v51  ;;  %v3233_v51 = vld [vmem:[%s6553_s5 + $0xcc8] sm:$0xff] }
 0x204   :  { %3915 = vmatprep.subr.bf16.mxu1 %v3914_v12  ;;  %v3235_v12 = vld [vmem:[%s6553_s5 + $0xcd8] sm:$0xff] }
 0x205   :  { %v3946_v2 = vpack.c.bf16 %v3235_v12, %v3233_v51 }
 0x207   :  { %3917 = vmatpush1.bf16.msra.mxu1 %v3916_v62  ;;  %v3237_v62 = vld [vmem:[%s6553_s5 + $0xce8] sm:$0xff] }
 0x208   :  { %3919 = vmatprep.subr.bf16.mxu1 %v3918_v52  ;;  %v3239_v52 = vld [vmem:[%s6553_s5 + $0xcf8] sm:$0xff] }
 0x209   :  { %v3950_v29 = vpack.c.bf16 %v3239_v52, %v3237_v62  ;;  %v2268_v52 = vrot.slane %v5340_v4, 1 }
 0x20b   :  { %3921 = vmatpush1.bf16.msra.mxu1 %v3920_v11  ;;  %v3241_v11 = vld [vmem:[%s6553_s5 + $0xd08] sm:$0xff] }
 0x20c   :  { %3923 = vmatprep.subr.bf16.mxu1 %v3922_v9  ;;  %v3243_v9 = vld [vmem:[%s6553_s5 + $0xd18] sm:$0xff] }
 0x20d   :  { %v3954_v14 = vpack.c.bf16 %v3243_v9, %v3241_v11 }
 0x20f   :  { %3925 = vmatpush1.bf16.msra.mxu1 %v3924_v8  ;;  %v2263_v8 = vrot.slane %v5110_v7, 1  ;;  %v3244_v7 = vld [vmem:[%s6553_s5 + $0xd20] sm:$0xff] }
 0x210   :  { %3927 = vmatprep.subr.bf16.mxu1 %v3926_v41  ;;  %v3245_v41 = vld [vmem:[%s6553_s5 + $0xd28] sm:$0xff] }
 0x211   :  { %v2264_v58 = vsel %vm721_vm3, %v2262_v21, %v2263_v8  ;;  %v2276_v24 = vsel %vm721_vm3, %v2263_v8, %v2275_v33 }
 0x213   :  { %3929 = vmatpush1.bf16.msra.mxu1 %v3928_v35  ;;  %v3958_v35 = vpack.c.bf16 %v3247_v25, %v3245_v41 }
 0x214   :  { %3931 = vmatprep.subr.bf16.mxu1 %v3930_v27  ;;  %v3246_v27 = vld [vmem:[%s6553_s5 + $0xd30] sm:$0xff] }
 0x215   :  { %v3960_v17 = vpack.c.bf16 %v3246_v27, %v3244_v7 }
 0x217   :  { %3933 = vmatpush1.bf16.msra.mxu1 %v3932_v15 }
 0x218   :  { %3935 = vmatprep.subr.bf16.mxu1 %v3934_v22  ;;  %v2287_v22 = vrot.slane %v5702_v56, 1  ;;  %v3253_v56 = vld [vmem:[%s6553_s5 + $0xd68] sm:$0xff] }
 0x21a   :  { %v2298_v54 = vsel %vm721_vm3, %v2287_v22, %v2297_v38 }
 0x21b   :  { %3937 = vmatpush1.bf16.msra.mxu1 %v3936_v3  ;;  %v3255_v3 = vld [vmem:[%s6553_s5 + $0xd78] sm:$0xff] }
 0x21c   :  { %3939 = vmatprep.subr.bf16.mxu1 %v3938_v13  ;;  %v2288_v13 = vsel %vm721_vm3, %v2277_v49, %v2287_v22  ;;  %v3966_v55 = vpack.c.bf16 %v3255_v3, %v3253_v56 }
 0x21f   :  { %3941 = vmatpush1.bf16.msra.mxu1 %v3940_v40  ;;  %v3254_v40 = vld [vmem:[%s6553_s5 + $0xd70] sm:$0xff] }
 0x220   :  { %3943 = vmatprep.subr.bf16.mxu1 %v3942_v5  ;;  %v2286_v5 = vsel %vm721_vm3, %v2275_v33, %v2285_v43  ;;  %v3968_v12 = vpack.c.bf16 %v3254_v40, %v3252_v28  ;;  %v2778_v40 = vld [vmem:[%s6556_s6] sm:$0x3] }
 0x223   :  { %3945 = vmatpush1.bf16.msra.mxu1 %v3944_v0  ;;  %v2296_v0 = vsel %vm721_vm3, %v2285_v43, %v2295_v26 }
 0x224   :  { %3947 = vmatprep.subr.bf16.mxu1 %v3946_v2 }
 0x227   :  { %3949 = vmatpush1.bf16.msra.mxu1 %v3948_v57  ;;  %v2270_v57 = vsel %vm721_vm3, %v2268_v52, %v2269_v42 }
 0x228   :  { %3951 = vmatprep.subr.bf16.mxu1 %v3950_v29  ;;  %v2279_v29 = vrot.slane %v5413_v63, 1  ;;  %v2300_v63 = vsel %vm721_vm3, %v2289_v20, %v2299_v45 }
 0x22a   :  { %v2280_v10 = vsel %vm721_vm3, %v2269_v42, %v2279_v29  ;;  %v2290_v4 = vsel %vm721_vm3, %v2279_v29, %v2289_v20 }
 0x22b   :  { %3953 = vmatpush1.bf16.msra.mxu1 %v3952_v36 }
 0x22c   :  { %3955 = vmatprep.subr.bf16.mxu1 %v3954_v14 }
 0x22d   :  { %v6445_v16 = vpop.f32.mrb[20].mxu1 }
 0x22e   :  { %2643 = vmatmul.mubr.f32.vlgmr.msra.gmra.mrb[30].mxu1 %v2264_v58  ;;  %v6457_v15 = vpop.f32.mrb[21].mxu1 }
 0x22f   :  { %2648 = vmatprep.mubr.f32.mxu1 %v2278_v31  ;;  %3957 = vmatpush1.bf16.msra.mxu1 %v3956_v39 }
 0x230   :  { %3959 = vmatprep.subr.bf16.mxu1 %v3958_v35 }
 0x231   :  { %v1938_v47 = vpop.f32.mrb[22].mxu1 }
 0x232   :  { %2649 = vmatmul.mubr.f32.gmra.mrb[32].mxu1 %v2276_v24  ;;  %v1940_v6 = vpop.f32.mrb[23].mxu1 }
 0x233   :  { %2654 = vmatprep.mubr.f32.mxu1 %v2288_v13  ;;  %3961 = vmatpush1.bf16.msra.mxu1 %v3960_v17 }
 0x234   :  { %3963 = vmatprep.subr.bf16.mxu1 %v3962_v48 }
 0x235   :  { %v1944_v30 = vpop.f32.mrb[24].mxu1 }
 0x236   :  { %2655 = vmatmul.mubr.f32.gmra.mrb[34].mxu1 %v2286_v5  ;;  %v1946_v51 = vpop.f32.mrb[25].mxu1  ;;  %v2783_v5 = vrot.slane %v2778_v40, %v5133_v44 }
 0x237   :  { %2660 = vmatprep.mubr.f32.mxu1 %v2298_v54  ;;  %3965 = vmatpush1.bf16.msra.mxu1 %v3964_v37 }
 0x238   :  { %3967 = vmatprep.subr.bf16.mxu1 %v3966_v55 }
 0x239   :  { %v1950_v2 = vpop.f32.mrb[26].mxu1 }
 0x23a   :  { %2661 = vmatmul.mubr.f32.gmra.mrb[36].mxu1 %v2296_v0  ;;  %v1952_v32 = vpop.f32.mrb[27].mxu1 }
 0x23b   :  { %3258 = vmatprep.mubr.msk.f32.mxu1 %vm721_vm3, %v2297_v38  ;;  %3969 = vmatpush1.bf16.msra.mxu1 %v3968_v12 }
 0x23d   :  { %v1956_v62 = vpop.f32.mrb[28].mxu1 }
 0x23e   :  { %3259 = vmatmul.mubr.msk.f32.gmra.mrb[38].mxu1 %vm721_vm3, %v2295_v26  ;;  %v1958_v19 = vpop.f32.mrb[29].mxu1  ;;  %v2787_v26 = vrot.slane %v2778_v40, %v5136_v34 }
 0x23f   :  { %2737 = vmatprep.mubr.f32.mxu1 %v6562_v1 }
 0x242   :  { %3260 = vmatmul.mubr.msk.f32.vlgmr.msra.gmra.mrb[30].mxu1 %vm1664_vm5, %v2270_v57 }
 0x243   :  { %2743 = vmatprep.mubr.f32.mxu1 %v6562_v1 }
 0x246   :  { %3261 = vmatmul.mubr.msk.f32.gmra.mrb[32].mxu1 %vm1664_vm5, %v2280_v10 }
 0x247   :  { %2749 = vmatprep.mubr.f32.mxu1 %v6562_v1 }
 0x24a   :  { %3262 = vmatmul.mubr.msk.f32.gmra.mrb[34].mxu1 %vm1664_vm5, %v2290_v4 }
 0x24b   :  { %2755 = vmatprep.mubr.f32.mxu1 %v6562_v1 }
 0x24e   :  { %3263 = vmatmul.mubr.msk.f32.gmra.mrb[36].mxu1 %vm1664_vm5, %v2300_v63 }
 0x24f   :  { %2761 = vmatprep.mubr.f32.mxu1 %v6562_v1 }
 0x252   :  { %3264 = vmatmul.mubr.msk.f32.gmra.mrb[38].mxu1 %vm1664_vm5, %v2326_v23 }
 0x258   :  { %v1837_v11 = vpop.f32.mrb[40].mxu0 }
 0x259   :  { %v3980_v9 = vadd.f32 %v6445_v16, %v1837_v11  ;;  %v1839_v36 = vpop.f32.mrb[41].mxu0 }
 0x25a   :  { %v3983_v53 = vadd.f32 %v6457_v15, %v1839_v36 }
 0x25c   :  { %v1843_v14 = vpop.f32.mrb[42].mxu0 }
 0x25d   :  { %v3986_v60 = vadd.f32 %v1938_v47, %v1843_v14  ;;  %v1845_v46 = vpop.f32.mrb[43].mxu0 }
 0x25e   :  { %v3989_v8 = vadd.f32 %v1940_v6, %v1845_v46 }
 0x260   :  { %v1849_v41 = vpop.f32.mrb[44].mxu0 }
 0x261   :  { %v3992_v25 = vadd.f32 %v1944_v30, %v1849_v41  ;;  %v1851_v49 = vpop.f32.mrb[45].mxu0 }
 0x262   :  { %v3995_v21 = vadd.f32 %v1946_v51, %v1851_v49 }
 0x264   :  { %v1855_v39 = vpop.f32.mrb[46].mxu0 }
 0x265   :  { %v3998_v1 = vadd.f32 %v1950_v2, %v1855_v39  ;;  %v1857_v35 = vpop.f32.mrb[47].mxu0 }
 0x266   :  { %v4001_v7 = vadd.f32 %v1952_v32, %v1857_v35 }
 0x268   :  { %v1861_v27 = vpop.f32.mrb[48].mxu0 }
 0x269   :  { %v4004_v58 = vadd.f32 %v1956_v62, %v1861_v27  ;;  %v1863_v33 = vpop.f32.mrb[49].mxu0 }
 0x26a   :  { %v4007_v59 = vadd.f32 %v1958_v19, %v1863_v33 }
 0x298   :  { %v2037_v16 = vpop.f32.mrb[50].mxu0 }
 0x299   :  { %v3981_v61 = vadd.f32 %v3980_v9, %v2037_v16  ;;  %v2039_v31 = vpop.f32.mrb[51].mxu0 }
 0x29a   :  { %v3984_v15 = vadd.f32 %v3983_v53, %v2039_v31 }
 0x29c   :  { %v2043_v22 = vpop.f32.mrb[52].mxu0 }
 0x29d   :  { %v3987_v17 = vadd.f32 %v3986_v60, %v2043_v22  ;;  %v2045_v48 = vpop.f32.mrb[53].mxu0 }
 0x29e   :  { %v3990_v18 = vadd.f32 %v3989_v8, %v2045_v48 }
 0x2a0   :  { %v2049_v50 = vpop.f32.mrb[54].mxu0 }
 0x2a1   :  { %v3993_v24 = vadd.f32 %v3992_v25, %v2049_v50  ;;  %v2051_v47 = vpop.f32.mrb[55].mxu0 }
 0x2a2   :  { %v3996_v43 = vadd.f32 %v3995_v21, %v2051_v47 }
 0x2a4   :  { %v2055_v56 = vpop.f32.mrb[56].mxu0 }
 0x2a5   :  { %v3999_v3 = vadd.f32 %v3998_v1, %v2055_v56  ;;  %v2057_v13 = vpop.f32.mrb[57].mxu0 }
 0x2a6   :  { %v4002_v6 = vadd.f32 %v4001_v7, %v2057_v13 }
 0x2a8   :  { %v2061_v38 = vpop.f32.mrb[58].mxu0 }
 0x2a9   :  { %v4005_v37 = vadd.f32 %v4004_v58, %v2061_v38  ;;  %v2063_v55 = vpop.f32.mrb[59].mxu0 }
 0x2aa   :  { %v4008_v28 = vadd.f32 %v4007_v59, %v2063_v55 }
 0x315   :  { %v2739_v30 = vpop.f32.mrb[30].mxu1 }
 0x316   :  { %v3982_v54 = vadd.f32 %v3981_v61, %v2739_v30  ;;  %v2741_v51 = vpop.f32.mrb[31].mxu1 }
 0x317   :  { %v3985_v12 = vadd.f32 %v3984_v15, %v2741_v51 }
 0x318   :  { %v2790_v0 = vadd.f32 %v3982_v54, %v2783_v5 }
 0x319   :  { %v2791_v2 = vadd.f32 %v3985_v12, %v2787_v26  ;;  %v2745_v32 = vpop.f32.mrb[32].mxu1 }
 0x31a   :  { %2800 = vst [vmem:[%s6557_s7] sm:$0xff] %v2790_v0  ;;  %v3988_v42 = vadd.f32 %v3987_v17, %v2745_v32  ;;  %v2747_v62 = vpop.f32.mrb[33].mxu1 }
 0x31b   :  { %2802 = vst.msk [vmem:[%s6557_s7 + $0x8] sm:$0xff] %vm2801_vm6, %v2791_v2  ;;  %v3991_v44 = vadd.f32 %v3990_v18, %v2747_v62 }
 0x31c   :  { %v2792_v34 = vadd.f32 %v3988_v42, %v2783_v5 }
 0x31d   :  { %v2793_v19 = vadd.f32 %v3991_v44, %v2787_v26  ;;  %v2751_v52 = vpop.f32.mrb[34].mxu1 }
 0x31e   :  { %2803 = vst [vmem:[%s6557_s7 + $0x10] sm:$0xff] %v2792_v34  ;;  %v3994_v57 = vadd.f32 %v3993_v24, %v2751_v52  ;;  %v2753_v29 = vpop.f32.mrb[35].mxu1 }
 0x31f   :  { %2804 = vst.msk [vmem:[%s6557_s7 + $0x18] sm:$0xff] %vm2801_vm6, %v2793_v19  ;;  %v3997_v10 = vadd.f32 %v3996_v43, %v2753_v29 }
 0x320   :  { %v2794_v20 = vadd.f32 %v3994_v57, %v2783_v5 }
 0x321   :  { %v2795_v4 = vadd.f32 %v3997_v10, %v2787_v26  ;;  %v2757_v45 = vpop.f32.mrb[36].mxu1 }
 0x322   :  { %2805 = vst [vmem:[%s6557_s7 + $0x20] sm:$0xff] %v2794_v20  ;;  %v4000_v63 = vadd.f32 %v3999_v3, %v2757_v45  ;;  %v2759_v23 = vpop.f32.mrb[37].mxu1 }
 0x323   :  { %2806 = vst.msk [vmem:[%s6557_s7 + $0x28] sm:$0xff] %vm2801_vm6, %v2795_v4  ;;  %v4003_v11 = vadd.f32 %v4002_v6, %v2759_v23 }
 0x324   :  { %v2796_v9 = vadd.f32 %v4000_v63, %v2783_v5 }
 0x325   :  { %v2797_v36 = vadd.f32 %v4003_v11, %v2787_v26  ;;  %v2763_v53 = vpop.f32.mrb[38].mxu1 }
 0x326   :  { %2807 = vst [vmem:[%s6557_s7 + $0x30] sm:$0xff] %v2796_v9  ;;  %v4006_v14 = vadd.f32 %v4005_v37, %v2763_v53  ;;  %v2765_v60 = vpop.f32.mrb[39].mxu1 }
 0x327   :  { %2808 = vst.msk [vmem:[%s6557_s7 + $0x38] sm:$0xff] %vm2801_vm6, %v2797_v36  ;;  %v4009_v46 = vadd.f32 %v4008_v28, %v2765_v60 }
 0x328   :  { %v2798_v8 = vadd.f32 %v4006_v14, %v2783_v5 }
 0x329   :  { %v2799_v41 = vadd.f32 %v4009_v46, %v2787_v26 }
 0x32a   :  { %2809 = vst [vmem:[%s6557_s7 + $0x40] sm:$0xff] %v2798_v8 }
 0x32b   :  { %2810 = vst.msk [vmem:[%s6557_s7 + $0x48] sm:$0xff] %vm2801_vm6, %v2799_v41 }

</bundles_post_ra>
